<compile_context>
chip_gen: v7x
topology: tpu7x:2x2x1
jax: 0.10.0
libtpu: 0.0.40
codegen_flags: <defaults>
</compile_context>

<pallas_src>
import jax
import jax.numpy as jnp
from jax.experimental import pallas as pl
from jax.experimental.pallas import tpu as pltpu

TABLE_DIM = 32
NUM_REPS = 3
QUERY_EMB_DIM = 32
MERGE_HIDDEN = QUERY_EMB_DIM * 4   # 128
NUM_HIDDEN = NUM_REPS * TABLE_DIM  # 96


def query_tower_kernel(
    num_ref, feat_ref,
    w1n_ref, b1n_ref, w_feat_ref, w_num_ref, bm1_ref, wm2_ref, bm2_ref,
    out_ref,
):
    f32 = jnp.float32

    # numerical_layer Linear(2, 96) on the VPU (f32): a K=2 matmul would
    # waste a full MXU push/drain, so use two broadcast FMAs + bias instead.
    nums = num_ref[...].astype(f32)                           # (TB, 2)
    h = (nums[:, 0:1] * w1n_ref[0:1, :]
         + nums[:, 1:2] * w1n_ref[1:2, :]
         + b1n_ref[...])
    h = jnp.maximum(h, 0.0)                                   # (TB, 96)

    # Merge hidden layer: one K=80 matmul over the host-concatenated
    # (cat | id | vec-folded) features, plus one K=96 matmul for the
    # numerical branch (Linear(96,96) folded into the merge weights on host).
    m = jnp.dot(feat_ref[...], w_feat_ref[...], preferred_element_type=f32)
    m = m + jnp.dot(h.astype(w_num_ref.dtype), w_num_ref[...],
                    preferred_element_type=f32)
    m = jnp.maximum(m + bm1_ref[...], 0.0)                    # (TB, 128) f32

    # Final Linear(128, 32). The output block spans the full 32-wide minor
    # dim, so the HBM writeback is contiguous.
    out_ref[...] = (jnp.dot(m.astype(wm2_ref.dtype), wm2_ref[...],
                            preferred_element_type=f32)
                    + bm2_ref[...]).astype(out_ref.dtype)


def fold_params(params, io_dtype):
    """Host-side algebraic folding of the independent linears into Wm1.

    Concat order in the reference forward (sorted keys):
      query_cat | query_id | numerical_0..2 | query_vec
    """
    wm1 = params["wm1"]                                    # (192, 128), [in, out]
    wm1_cat = wm1[0 * TABLE_DIM:1 * TABLE_DIM]             # rows for "query_cat"
    wm1_id = wm1[1 * TABLE_DIM:2 * TABLE_DIM]              # rows for "query_id"
    wm1_num = wm1[2 * TABLE_DIM:2 * TABLE_DIM + NUM_HIDDEN]
    wm1_vec = wm1[2 * TABLE_DIM + NUM_HIDDEN:]

    w_num_merge = params["w2n"] @ wm1_num                  # (96, 128)
    w_vec_merge = params["wv"] @ wm1_vec                   # (16, 128)
    bm1_eff = (params["bm1"]
               + params["b2n"] @ wm1_num
               + params["bv"] @ wm1_vec)                   # (1, 128)

    # Rows ordered to match the host activation concat: cat | id | vec.
    w_feat_merge = jnp.concatenate([wm1_cat, wm1_id, w_vec_merge], axis=0)

    return dict(
        w1n=params["w1n"].astype(jnp.float32),             # VPU path stays f32
        b1n=params["b1n"].astype(jnp.float32),
        w_feat_merge=w_feat_merge.astype(io_dtype),        # MXU weights in io_dtype
        w_num_merge=w_num_merge.astype(io_dtype),
        bm1_eff=bm1_eff.astype(jnp.float32),
        wm2=params["wm2"].astype(io_dtype),
        bm2=params["bm2"].astype(jnp.float32),
    )


def query_tower_forward(params, batch, *, io_dtype=jnp.bfloat16,
                        max_tile_b=1024, min_rows_for_split=16):
    """Wrapper: gathers/concat/folding in JAX, fused MLP stack in Pallas."""
    folded = fold_params(params, io_dtype)

    # Embedding lookups (data-dependent gathers) stay outside the kernel.
    id_emb = params["query_emb_table"][batch["query_id"]]            # (B, 32)
    cat_emb = params["cat_emb_table"][batch["query_cat"]]            # (B, 32)

    # One host-side concat per stream (order matches w_feat_merge rows) and a
    # single pad per stream -> 2 activation DMAs per grid step.
    feats = jnp.concatenate(
        [cat_emb, id_emb, batch["query_vec"]], axis=1).astype(io_dtype)   # (B, 80)
    nums = jnp.concatenate(
        [batch["num_a"], batch["num_b"]], axis=1).astype(jnp.float32)     # (B, 2)

    b, feat_dim = feats.shape

    # Tiling: a couple of large tiles, not many small ones — this kernel is
    # per-grid-step-overhead bound. Use >= 2 tiles when the batch is big
    # enough so both v7x TensorCores get work; cap rows/tile at max_tile_b.
    # v5e/v6e just see 1-2 large steps, which is what we want there too.
    n_tiles = max(2, pl.cdiv(b, max_tile_b)) if b >= min_rows_for_split else 1
    tb = pl.cdiv(pl.cdiv(b, n_tiles), 8) * 8       # rows per tile (multiple of 8)
    n_tiles = pl.cdiv(b, tb)
    b_pad = n_tiles * tb

    if b_pad != b:
        feats = jnp.pad(feats, ((0, b_pad - b), (0, 0)))
        nums = jnp.pad(nums, ((0, b_pad - b), (0, 0)))

    acts = [nums, feats]
    weights = [folded["w1n"], folded["b1n"], folded["w_feat_merge"],
               folded["w_num_merge"], folded["bm1_eff"], folded["wm2"],
               folded["bm2"]]

    flops = 2 * b_pad * (2 * NUM_HIDDEN
                         + feat_dim * MERGE_HIDDEN
                         + NUM_HIDDEN * MERGE_HIDDEN
                         + MERGE_HIDDEN * QUERY_EMB_DIM)
    bytes_accessed = (sum(int(x.size) * jnp.dtype(x.dtype).itemsize
                          for x in acts + weights)
                      + b_pad * QUERY_EMB_DIM * 4)

    out = pl.pallas_call(
        query_tower_kernel,
        grid=(n_tiles,),
        in_specs=(
            # Activations: batch-blocked.
            [pl.BlockSpec((tb, x.shape[1]), lambda i: (i, 0)) for x in acts]
            # Weights: constant block index -> stay VMEM-resident across tiles.
            + [pl.BlockSpec(w.shape, lambda i: (0, 0)) for w in weights]
        ),
        out_specs=pl.BlockSpec((tb, QUERY_EMB_DIM), lambda i: (i, 0)),
        out_shape=jax.ShapeDtypeStruct((b_pad, QUERY_EMB_DIM), jnp.float32),
        compiler_params=pltpu.CompilerParams(
            dimension_semantics=("parallel",)),
        cost_estimate=pl.CostEstimate(
            flops=flops, transcendentals=0, bytes_accessed=bytes_accessed),
    )(*acts, *weights)
    return out[:b]


def reference_forward(params, batch):
    """Pure-JAX reference mirroring the PyTorch forward exactly (un-folded)."""
    id_emb = params["query_emb_table"][batch["query_id"]]
    cat_emb = params["cat_emb_table"][batch["query_cat"]]
    num_x = jnp.concatenate([batch["num_a"], batch["num_b"]], axis=1)
    h = jnp.maximum(num_x @ params["w1n"] + params["b1n"], 0.0)
    num_out = h @ params["w2n"] + params["b2n"]
    vec_out = batch["query_vec"] @ params["wv"] + params["bv"]
    all_feat = jnp.concatenate(
        [cat_emb, id_emb,
         num_out[:, 0:32], num_out[:, 32:64], num_out[:, 64:96],
         vec_out], axis=1)
    m = jnp.maximum(all_feat @ params["wm1"] + params["bm1"], 0.0)
    return m @ params["wm2"] + params["bm2"]


def make_linear(key, in_f, out_f):
    """PyTorch-style uniform init; weight stored transposed [in, out]."""
    kw, kb = jax.random.split(key)
    bound = 1.0 / jnp.sqrt(float(in_f))
    w = jax.random.uniform(kw, (in_f, out_f), jnp.float32, -bound, bound)
    b = jax.random.uniform(kb, (1, out_f), jnp.float32, -bound, bound)
    return w, b


if __name__ == "__main__":
    key = jax.random.PRNGKey(0)
    keys = jax.random.split(key, 12)

    B = 512
    QUERY_CARD = 100
    CAT_CARD = 50
    VEC_DIM = 16
    N_NUMERICAL = 2
    N_FEATURES = 1 + 1 + NUM_REPS + 1  # 6

    params = {}
    params["query_emb_table"] = jax.random.normal(
        keys[0], (QUERY_CARD, TABLE_DIM), jnp.float32)
    params["cat_emb_table"] = jax.random.normal(
        keys[1], (CAT_CARD, TABLE_DIM), jnp.float32)
    params["w1n"], params["b1n"] = make_linear(keys[2], N_NUMERICAL, NUM_HIDDEN)
    params["w2n"], params["b2n"] = make_linear(keys[3], NUM_HIDDEN, NUM_HIDDEN)
    params["wv"], params["bv"] = make_linear(keys[4], VEC_DIM, TABLE_DIM)
    params["wm1"], params["bm1"] = make_linear(
        keys[5], N_FEATURES * TABLE_DIM, MERGE_HIDDEN)
    params["wm2"], params["bm2"] = make_linear(
        keys[6], MERGE_HIDDEN, QUERY_EMB_DIM)

    batch = {
        "query_id": jax.random.randint(keys[7], (B,), 0, QUERY_CARD, jnp.int32),
        "query_cat": jax.random.randint(keys[8], (B,), 0, CAT_CARD, jnp.int32),
        "num_a": jax.random.normal(keys[9], (B, 1), jnp.float32),
        "num_b": jax.random.normal(keys[10], (B, 1), jnp.float32),
        "query_vec": jax.random.normal(keys[11], (B, VEC_DIM), jnp.float32),
    }

    ref = jax.block_until_ready(reference_forward(params, batch))

    # Tight functional check with f32 I/O (only weight-folding re-association).
    out_f32 = jax.block_until_ready(
        query_tower_forward(params, batch, io_dtype=jnp.float32))
    assert out_f32.shape == (B, QUERY_EMB_DIM), out_f32.shape
    assert jnp.allclose(out_f32, ref, rtol=2e-4, atol=2e-4), (
        float(jnp.max(jnp.abs(out_f32 - ref))))

    # Recommended fast path: bf16 activations / MXU weights, f32 accumulate.
    # Looser tolerance vs the f32 reference is a precision tradeoff, not a bug.
    out_bf16 = jax.block_until_ready(
        query_tower_forward(params, batch, io_dtype=jnp.bfloat16))
    assert out_bf16.shape == (B, QUERY_EMB_DIM), out_bf16.shape
    assert jnp.allclose(out_bf16, ref, rtol=5e-2, atol=1e-1), (
        float(jnp.max(jnp.abs(out_bf16 - ref))))

    print("KERNEL_OK")
</pallas_src>

<mosaic_0001>
module attributes {stable_mosaic.version = 11 : i64} {
  func.func @query_tower_kernel(%arg0: i32, %arg1: memref<256x2xf32, #tpu.memory_space<vmem>>, %arg2: memref<256x80xf32, #tpu.memory_space<vmem>>, %arg3: memref<2x96xf32, #tpu.memory_space<vmem>>, %arg4: memref<1x96xf32, #tpu.memory_space<vmem>>, %arg5: memref<80x128xf32, #tpu.memory_space<vmem>>, %arg6: memref<96x128xf32, #tpu.memory_space<vmem>>, %arg7: memref<1x128xf32, #tpu.memory_space<vmem>>, %arg8: memref<128x32xf32, #tpu.memory_space<vmem>>, %arg9: memref<1x32xf32, #tpu.memory_space<vmem>>, %arg10: memref<256x32xf32, #tpu.memory_space<vmem>>) attributes {dimension_semantics = [#tpu.dimension_semantics<parallel>], iteration_bounds = array<i64: 2>, scalar_prefetch = 0 : i64, scratch_operands = 0 : i64, tpu.core_type = #tpu.core_type<tc>, window_params = [{transform_indices = @transform_0, window_bounds = array<i64: 256, 2>}, {transform_indices = @transform_1, window_bounds = array<i64: 256, 80>}, {pipeline_mode = #tpu.pipeline_mode<synchronous>, transform_indices = @transform_2, window_bounds = array<i64: 2, 96>}, {pipeline_mode = #tpu.pipeline_mode<synchronous>, transform_indices = @transform_3, window_bounds = array<i64: 1, 96>}, {pipeline_mode = #tpu.pipeline_mode<synchronous>, transform_indices = @transform_4, window_bounds = array<i64: 80, 128>}, {pipeline_mode = #tpu.pipeline_mode<synchronous>, transform_indices = @transform_5, window_bounds = array<i64: 96, 128>}, {pipeline_mode = #tpu.pipeline_mode<synchronous>, transform_indices = @transform_6, window_bounds = array<i64: 1, 128>}, {pipeline_mode = #tpu.pipeline_mode<synchronous>, transform_indices = @transform_7, window_bounds = array<i64: 128, 32>}, {pipeline_mode = #tpu.pipeline_mode<synchronous>, transform_indices = @transform_8, window_bounds = array<i64: 1, 32>}, {transform_indices = @transform_9, window_bounds = array<i64: 256, 32>}]} {
    %c0 = arith.constant 0 : index
    %c0_0 = arith.constant 0 : index
    %0 = vector.load %arg1[%c0, %c0_0] : memref<256x2xf32, #tpu.memory_space<vmem>>, vector<256x2xf32>
    %1 = vector.extract_strided_slice %0 {offsets = [0, 0], sizes = [256, 1], strides = [1, 1]} : vector<256x2xf32> to vector<256x1xf32>
    %c0_1 = arith.constant 0 : index
    %c0_2 = arith.constant 0 : index
    %2 = vector.load %arg3[%c0_1, %c0_2] : memref<2x96xf32, #tpu.memory_space<vmem>>, vector<1x96xf32>
    %3 = vector.broadcast %1 : vector<256x1xf32> to vector<256x96xf32>
    %4 = vector.broadcast %2 : vector<1x96xf32> to vector<256x96xf32>
    %5 = arith.mulf %3, %4 : vector<256x96xf32>
    %6 = vector.extract_strided_slice %0 {offsets = [0, 1], sizes = [256, 1], strides = [1, 1]} : vector<256x2xf32> to vector<256x1xf32>
    %c1 = arith.constant 1 : index
    %c0_3 = arith.constant 0 : index
    %7 = vector.load %arg3[%c1, %c0_3] : memref<2x96xf32, #tpu.memory_space<vmem>>, vector<1x96xf32>
    %8 = vector.broadcast %6 : vector<256x1xf32> to vector<256x96xf32>
    %9 = vector.broadcast %7 : vector<1x96xf32> to vector<256x96xf32>
    %10 = arith.mulf %8, %9 : vector<256x96xf32>
    %11 = arith.addf %5, %10 : vector<256x96xf32>
    %c0_4 = arith.constant 0 : index
    %c0_5 = arith.constant 0 : index
    %12 = vector.load %arg4[%c0_4, %c0_5] : memref<1x96xf32, #tpu.memory_space<vmem>>, vector<1x96xf32>
    %13 = vector.broadcast %12 : vector<1x96xf32> to vector<256x96xf32>
    %14 = arith.addf %11, %13 : vector<256x96xf32>
    %cst = arith.constant 0.000000e+00 : f32
    %15 = vector.broadcast %cst : f32 to vector<256x96xf32>
    %16 = arith.maximumf %14, %15 : vector<256x96xf32>
    %c0_6 = arith.constant 0 : index
    %c0_7 = arith.constant 0 : index
    %17 = vector.load %arg2[%c0_6, %c0_7] : memref<256x80xf32, #tpu.memory_space<vmem>>, vector<256x80xf32>
    %c0_8 = arith.constant 0 : index
    %c0_9 = arith.constant 0 : index
    %18 = vector.load %arg5[%c0_8, %c0_9] : memref<80x128xf32, #tpu.memory_space<vmem>>, vector<80x128xf32>
    %cst_10 = arith.constant dense<0.000000e+00> : vector<256x128xf32>
    %19 = tpu.matmul %17, %18, %cst_10 {dimension_numbers = #tpu.dot_dimension_numbers<[1], [0], [0], [1], [0, 0, 1, 1], [], []>} : vector<256x80xf32>, vector<80x128xf32>, vector<256x128xf32> -> vector<256x128xf32>
    %c0_11 = arith.constant 0 : index
    %c0_12 = arith.constant 0 : index
    %20 = vector.load %arg6[%c0_11, %c0_12] : memref<96x128xf32, #tpu.memory_space<vmem>>, vector<96x128xf32>
    %cst_13 = arith.constant dense<0.000000e+00> : vector<256x128xf32>
    %21 = tpu.matmul %16, %20, %cst_13 {dimension_numbers = #tpu.dot_dimension_numbers<[1], [0], [0], [1], [0, 0, 1, 1], [], []>} : vector<256x96xf32>, vector<96x128xf32>, vector<256x128xf32> -> vector<256x128xf32>
    %22 = arith.addf %19, %21 : vector<256x128xf32>
    %c0_14 = arith.constant 0 : index
    %c0_15 = arith.constant 0 : index
    %23 = vector.load %arg7[%c0_14, %c0_15] : memref<1x128xf32, #tpu.memory_space<vmem>>, vector<1x128xf32>
    %24 = vector.broadcast %23 : vector<1x128xf32> to vector<256x128xf32>
    %25 = arith.addf %22, %24 : vector<256x128xf32>
    %cst_16 = arith.constant 0.000000e+00 : f32
    %26 = vector.broadcast %cst_16 : f32 to vector<256x128xf32>
    %27 = arith.maximumf %25, %26 : vector<256x128xf32>
    %c0_17 = arith.constant 0 : index
    %c0_18 = arith.constant 0 : index
    %28 = vector.load %arg8[%c0_17, %c0_18] : memref<128x32xf32, #tpu.memory_space<vmem>>, vector<128x32xf32>
    %cst_19 = arith.constant dense<0.000000e+00> : vector<256x32xf32>
    %29 = tpu.matmul %27, %28, %cst_19 {dimension_numbers = #tpu.dot_dimension_numbers<[1], [0], [0], [1], [0, 0, 1, 1], [], []>} : vector<256x128xf32>, vector<128x32xf32>, vector<256x32xf32> -> vector<256x32xf32>
    %c0_20 = arith.constant 0 : index
    %c0_21 = arith.constant 0 : index
    %30 = vector.load %arg9[%c0_20, %c0_21] : memref<1x32xf32, #tpu.memory_space<vmem>>, vector<1x32xf32>
    %31 = vector.broadcast %30 : vector<1x32xf32> to vector<256x32xf32>
    %32 = arith.addf %29, %31 : vector<256x32xf32>
    %c0_22 = arith.constant 0 : index
    %c0_23 = arith.constant 0 : index
    %33 = vector.load %arg10[%c0_22, %c0_23] : memref<256x32xf32, #tpu.memory_space<vmem>>, vector<256x32xf32>
    tpu.vector_store %arg10[%c0_22, %c0_23], %32 {strides = array<i32>} : memref<256x32xf32, #tpu.memory_space<vmem>>, vector<256x32xf32>,
    return
  }
  func.func @transform_0(%arg0: i32) -> (i32, i32) {
    %c0_i32 = arith.constant 0 : i32
    %c0_i32_0 = arith.constant 0 : i32
    return %arg0, %c0_i32 : i32, i32
  }
  func.func @transform_1(%arg0: i32) -> (i32, i32) {
    %c0_i32 = arith.constant 0 : i32
    %c0_i32_0 = arith.constant 0 : i32
    return %arg0, %c0_i32 : i32, i32
  }
  func.func @transform_2(%arg0: i32) -> (i32, i32) {
    %c0_i32 = arith.constant 0 : i32
    %c0_i32_0 = arith.constant 0 : i32
    %c0_i32_1 = arith.constant 0 : i32
    return %c0_i32, %c0_i32_0 : i32, i32
  }
  func.func @transform_3(%arg0: i32) -> (i32, i32) {
    %c0_i32 = arith.constant 0 : i32
    %c0_i32_0 = arith.constant 0 : i32
    %c0_i32_1 = arith.constant 0 : i32
    return %c0_i32, %c0_i32_0 : i32, i32
  }
  func.func @transform_4(%arg0: i32) -> (i32, i32) {
    %c0_i32 = arith.constant 0 : i32
    %c0_i32_0 = arith.constant 0 : i32
    %c0_i32_1 = arith.constant 0 : i32
    return %c0_i32, %c0_i32_0 : i32, i32
  }
  func.func @transform_5(%arg0: i32) -> (i32, i32) {
    %c0_i32 = arith.constant 0 : i32
    %c0_i32_0 = arith.constant 0 : i32
    %c0_i32_1 = arith.constant 0 : i32
    return %c0_i32, %c0_i32_0 : i32, i32
  }
  func.func @transform_6(%arg0: i32) -> (i32, i32) {
    %c0_i32 = arith.constant 0 : i32
    %c0_i32_0 = arith.constant 0 : i32
    %c0_i32_1 = arith.constant 0 : i32
    return %c0_i32, %c0_i32_0 : i32, i32
  }
  func.func @transform_7(%arg0: i32) -> (i32, i32) {
    %c0_i32 = arith.constant 0 : i32
    %c0_i32_0 = arith.constant 0 : i32
    %c0_i32_1 = arith.constant 0 : i32
    return %c0_i32, %c0_i32_0 : i32, i32
  }
  func.func @transform_8(%arg0: i32) -> (i32, i32) {
    %c0_i32 = arith.constant 0 : i32
    %c0_i32_0 = arith.constant 0 : i32
    %c0_i32_1 = arith.constant 0 : i32
    return %c0_i32, %c0_i32_0 : i32, i32
  }
  func.func @transform_9(%arg0: i32) -> (i32, i32) {
    %c0_i32 = arith.constant 0 : i32
    %c0_i32_0 = arith.constant 0 : i32
    return %arg0, %c0_i32 : i32, i32
  }
}

</mosaic_0001>

<bundles_post_ra>
// kernel: tpu_custom_call.1
= control target key start
LH: loop header
LB: loop body
LE: loop exit
PB: predicated region body
PF: predicated region fallthrough
CT: control target
= control target key end

     0   :  { %s2604_s30 = smov 0   ;;  %s3140_s0 = inlined_call_operand.vmem [shape: f32[512,2], index: 0, kind: input, shape index: {}]   ;;  %s3141_s1 = inlined_call_operand.vmem [shape: f32[512,80], index: 1, kind: input, shape index: {}]   ;;  %s3142_s2 = inlined_call_operand.vmem [shape: f32[2,96], index: 2, kind: input, shape index: {}]   ;;  %s3143_s3 = inlined_call_operand.vmem [shape: f32[1,96], index: 3, kind: input, shape index: {}]   ;;  %s3144_s4 = inlined_call_operand.vmem [shape: f32[80,128], index: 4, kind: input, shape index: {}]   ;;  %s3145_s5 = inlined_call_operand.vmem [shape: f32[96,128], index: 5, kind: input, shape index: {}]   ;;  %s3146_s6 = inlined_call_operand.vmem [shape: f32[1,128], index: 6, kind: input, shape index: {}]   ;;  %s3147_s7 = inlined_call_operand.vmem [shape: f32[128,32], index: 7, kind: input, shape index: {}]   ;;  %s3148_s8 = inlined_call_operand.vmem [shape: f32[1,32], index: 8, kind: input, shape index: {}]   ;;  %s3149_s9 = inlined_call_operand.vmem [shape: f32[512,32], index: 9, kind: output, shape index: {}]  }
   0x1 LB: > { %s1973_s10 = sadd.s32 4294967295, %s2550_s30   ;;  %p1977_p0 = scmp.ge.s32.totalorder %s2550_s30, 1  ;;  %s2550_s30 = sphi %s2604_s30, %s19_s30  }
   0x2   : > { %p299_p1 = scmp.lt.s32.totalorder %s2550_s30, 3 }
   0x4   : > { %p300_p2 = pnand %p1977_p0, %p299_p1 }
   0x5   : > { %s1978_s11 = sshll.u32 (!%p300_p2), %s1973_s10, 5  ;;  %v897_v0 = vld [vmem:[%s3145_s5] sm:$0xff] (!%p300_p2)  ;;  %v898_v1 = vld [vmem:[%s3145_s5 + $0x8] sm:$0xff] (!%p300_p2)  ;;  %v899_v2 = vld [vmem:[%s3145_s5 + $0x10] sm:$0xff] (!%p300_p2)  ;;  %v2552_v3 = vmov (!%p300_p2), 0   ;;  %v2553_v12 = vmov (!%p300_p2), 1  }
   0x6   : > { %303 = sbr.rel (%p300_p2) target bundleno = 715 (0x2cb), region = 56  ;;  %2541 = vset.pattern.permute.xlu1 (!%p300_p2), %v2552_v3  ;;  %2539 = vset.pattern.permute.xlu0 (!%p300_p2), %v2552_v3  ;;  %p341_p3 = scmp.lt.s32.totalorder (!%p300_p2), %s1978_s11, 63  ;;  %v2409_v4 = vpack.c.bf16 (!%p300_p2), %v898_v1, %v897_v0  ;;  %v900_v5 = vld [vmem:[%s3145_s5 + $0x18] sm:$0xff] (!%p300_p2)  ;;  %v901_v7 = vld [vmem:[%s3145_s5 + $0x20] sm:$0xff] (!%p300_p2)  ;;  %v902_v8 = vld [vmem:[%s3145_s5 + $0x28] sm:$0xff] (!%p300_p2)  ;;  %vm909_vm0 = vcmask (!%p300_p2), 785408  }
   0x7   : > { %v2413_v6 = vpack.c.bf16 (!%p300_p2), %v900_v5, %v899_v2  ;;  %v2417_v9 = vpack.c.bf16 (!%p300_p2), %v902_v8, %v901_v7  ;;  %v903_v14 = vld [vmem:[%s3145_s5 + $0x30] sm:$0xff] (!%p300_p2)  ;;  %v904_v16 = vld [vmem:[%s3145_s5 + $0x38] sm:$0xff] (!%p300_p2)  ;;  %v905_v18 = vld [vmem:[%s3145_s5 + $0x40] sm:$0xff] (!%p300_p2)  ;;  %vm1231_vm1 = vcmask (!%p300_p2), 654336   ;;  %vm1872_vm2 = vcmask (!%p300_p2), 261120  }
   0x8   : > { %2410 = vmatprep.subr.bf16.mxu0 (!%p300_p2), %v2409_v4  ;;  %2485 = vmatprep.subr.bf16.mxu1 (!%p300_p2), %v2409_v4  ;;  %v2421_v17 = vpack.c.bf16 (!%p300_p2), %v904_v16, %v903_v14  ;;  %v906_v19 = vld [vmem:[%s3145_s5 + $0x48] sm:$0xff] (!%p300_p2)  ;;  %v907_v21 = vld [vmem:[%s3145_s5 + $0x50] sm:$0xff] (!%p300_p2)  ;;  %v908_v22 = vld [vmem:[%s3145_s5 + $0x58] sm:$0xff] (!%p300_p2) }
   0x9   : > { %2412 = vmatpush3.bf16.msra.mxu0 (!%p300_p2), %v2409_v4  ;;  %2491 = vmatpush3.bf16.msra.mxu1 (!%p300_p2), %v2409_v4  ;;  %v2425_v20 = vpack.c.bf16 (!%p300_p2), %v906_v19, %v905_v18  ;;  %v2429_v24 = vpack.c.bf16 (!%p300_p2), %v908_v22, %v907_v21  ;;  %v887_v32 = vld [vmem:[%s3144_s4] sm:$0xff] (!%p300_p2)  ;;  %v888_v33 = vld [vmem:[%s3144_s4 + $0x8] sm:$0xff] (!%p300_p2) }
   0xa   : > { %2414 = vmatprep.subr.bf16.mxu0 (!%p300_p2), %v2413_v6  ;;  %2486 = vmatprep.subr.bf16.mxu1 (!%p300_p2), %v2413_v6  ;;  %v2674_v34 = vpack.c.bf16 (!%p300_p2), %v888_v33, %v887_v32  ;;  %v2700_v57 = vld [vmem:[%s3142_s2] ss:$0 sm:$0xff] (!%p300_p2)  ;;  %v2705_v58 = vld [vmem:[%s3142_s2 + $0x1] ss:$0 sm:$0xff] (!%p300_p2)  ;;  %v893_v32 = vld [vmem:[%s3144_s4 + $0x30] sm:$0xff] (!%p300_p2) }
   0xb   : > { %v2714_v1 = vld [vmem:[%s3143_s3] ss:$0 sm:$0xff] (!%p300_p2)  ;;  %v894_v33 = vld [vmem:[%s3144_s4 + $0x38] sm:$0xff] (!%p300_p2) }
   0xc   : > { %v1624_v2 = vld [vmem:[%s3147_s7] sm:$0xff] (!%p300_p2) }
   0xd   : > { %s3151_s11 = smov (!%p341_p3, %s1978_s11), 63  ;;  %2416 = vmatpush3.bf16.msra.mxu0 %v2413_v6  ;;  %2492 = vmatpush3.bf16.msra.mxu1 %v2413_v6  ;;  %v891_v22 = vld [vmem:[%s3144_s4 + $0x20] sm:$0xff] }
   0xe   : > { %s2630_s24 = sshll.u32 %s3151_s11, 3  ;;  %2418 = vmatprep.subr.bf16.mxu0 %v2417_v9  ;;  %2487 = vmatprep.subr.bf16.mxu1 %v2417_v9 }
   0xf   : > { %s2636_s27 = scalar_lea.vmem %s3140_s0, %s2630_s24  ;;  %s2812_s14 = scalar_lea.vmem %s3141_s1, %s2630_s24 }
  0x10   : > { %v359_v10 = vld [vmem:[%s2636_s27 + $0x8] sm:$0xff]  ;;  %v358_v11 = vld [vmem:[%s2636_s27] sm:$0xff]  ;;  %v360_v13 = vld [vmem:[%s2636_s27 + $0x10] sm:$0xff]  ;;  %s3039_s11 = scalar_lea.vmem %s3149_s9, %s2630_s24 }
  0x11   : > { %398 = vperm.xlu1 %2541, %v359_v10   ;;  %393 = vperm.xlu0 %2539, %v358_v11   ;;  %v361_v15 = vld [vmem:[%s2636_s27 + $0x18] sm:$0xff]  ;;  %v362_v23 = vld [vmem:[%s2636_s27 + $0x20] sm:$0xff]  ;;  %v363_v25 = vld [vmem:[%s2636_s27 + $0x28] sm:$0xff] }
  0x12   : > { %2420 = vmatpush3.bf16.msra.mxu0 %v2417_v9  ;;  %2493 = vmatpush3.bf16.msra.mxu1 %v2417_v9  ;;  %v364_v26 = vld [vmem:[%s2636_s27 + $0x30] sm:$0xff]  ;;  %v365_v27 = vld [vmem:[%s2636_s27 + $0x38] sm:$0xff]  ;;  %v366_v28 = vld [vmem:[%s2636_s27 + $0x40] sm:$0xff] }
  0x13   : > { %2422 = vmatprep.subr.bf16.mxu0 %v2421_v17  ;;  %2488 = vmatprep.subr.bf16.mxu1 %v2421_v17  ;;  %v367_v29 = vld [vmem:[%s2636_s27 + $0x48] sm:$0xff]  ;;  %v368_v30 = vld [vmem:[%s2636_s27 + $0x50] sm:$0xff]  ;;  %v369_v31 = vld [vmem:[%s2636_s27 + $0x58] sm:$0xff] }
  0x14   : > { %v370_v35 = vld [vmem:[%s2636_s27 + $0x60] sm:$0xff]  ;;  %v371_v36 = vld [vmem:[%s2636_s27 + $0x68] sm:$0xff]  ;;  %v372_v37 = vld [vmem:[%s2636_s27 + $0x70] sm:$0xff] }
  0x15   : > { %2542 = vset.pattern.permute.xlu1 %v2553_v12  ;;  %2540 = vset.pattern.permute.xlu0 %v2553_v12  ;;  %v373_v38 = vld [vmem:[%s2636_s27 + $0x78] sm:$0xff]  ;;  %v374_v39 = vld [vmem:[%s2636_s27 + $0x80] sm:$0xff]  ;;  %v375_v40 = vld [vmem:[%s2636_s27 + $0x88] sm:$0xff] }
  0x16   : > { %593 = vperm.xlu1 %2542, %v359_v10   ;;  %589 = vperm.xlu0 %2540, %v358_v11   ;;  %v376_v41 = vld [vmem:[%s2636_s27 + $0x90] sm:$0xff]  ;;  %v377_v42 = vld [vmem:[%s2636_s27 + $0x98] sm:$0xff]  ;;  %v378_v43 = vld [vmem:[%s2636_s27 + $0xa0] sm:$0xff] }
  0x17   : > { %2424 = vmatpush3.bf16.msra.mxu0 %v2421_v17  ;;  %2494 = vmatpush3.bf16.msra.mxu1 %v2421_v17  ;;  %v379_v44 = vld [vmem:[%s2636_s27 + $0xa8] sm:$0xff]  ;;  %v380_v45 = vld [vmem:[%s2636_s27 + $0xb0] sm:$0xff]  ;;  %v381_v46 = vld [vmem:[%s2636_s27 + $0xb8] sm:$0xff] }
  0x18   : > { %2426 = vmatprep.subr.bf16.mxu0 %v2425_v20  ;;  %2489 = vmatprep.subr.bf16.mxu1 %v2425_v20  ;;  %v382_v47 = vld [vmem:[%s2636_s27 + $0xc0] sm:$0xff]  ;;  %v383_v48 = vld [vmem:[%s2636_s27 + $0xc8] sm:$0xff]  ;;  %v384_v49 = vld [vmem:[%s2636_s27 + $0xd0] sm:$0xff] }
  0x19   : > { %v385_v50 = vld [vmem:[%s2636_s27 + $0xd8] sm:$0xff]  ;;  %v386_v51 = vld [vmem:[%s2636_s27 + $0xe0] sm:$0xff]  ;;  %v387_v52 = vld [vmem:[%s2636_s27 + $0xe8] sm:$0xff] }
  0x1a   : > { %2543 = vset.pattern.permute.xlu1 %v2552_v3  ;;  %597 = vperm.xlu0 %2540, %v360_v13   ;;  %v388_v53 = vld [vmem:[%s2636_s27 + $0xf0] sm:$0xff]  ;;  %v389_v54 = vld [vmem:[%s2636_s27 + $0xf8] sm:$0xff]  ;;  %v1625_v3 = vld [vmem:[%s3147_s7 + $0x8] sm:$0xff] }
  0x1b   : > { %403 = vperm.xlu1 %2543, %v360_v13   ;;  %2428 = vmatpush3.bf16.msra.mxu0 %v2425_v20  ;;  %v2722_v6 = vpack.c.bf16 %v1625_v3, %v1624_v2  ;;  %v889_v12 = vld [vmem:[%s3144_s4 + $0x10] sm:$0xff]  ;;  %v890_v13 = vld [vmem:[%s3144_s4 + $0x18] sm:$0xff] }
  0x1c   : > { %2430 = vmatprep.subr.bf16.mxu0 %v2429_v24  ;;  %2495 = vmatpush3.bf16.msra.mxu1 %v2425_v20  ;;  %v2437_v19 = vpack.c.bf16 %v890_v13, %v889_v12 }
  0x1d   : > { %2490 = vmatprep.subr.bf16.mxu1 %v2429_v24 }
  0x1e   : > { %601 = vperm.xlu0 %2540, %v361_v15  }
  0x1f   : > { %408 = vperm.xlu1 %2543, %v361_v15   ;;  %2432 = vmatpush3.bf16.msra.mxu0 %v2429_v24 }
  0x20   : > { %2496 = vmatpush3.bf16.msra.mxu1 %v2429_v24  ;;  %2434 = vmatprep.subr.bf16.mxu0 %v2674_v34 }
  0x21   : > { %2454 = vmatprep.subr.bf16.mxu1 %v2722_v6 }
  0x22   : > { %605 = vperm.xlu0 %2540, %v362_v23  }
  0x23   : > { %413 = vperm.xlu1 %2543, %v362_v23   ;;  %v892_v23 = vld [vmem:[%s3144_s4 + $0x28] sm:$0xff] }
  0x26   : > { %609 = vperm.xlu0 %2540, %v363_v25  }
  0x27   : > { %418 = vperm.xlu1 %2543, %v363_v25  }
  0x2a   : > { %613 = vperm.xlu0 %2540, %v364_v26  }
  0x2b   : > { %423 = vperm.xlu1 %2543, %v364_v26  }
  0x2e   : > { %617 = vperm.xlu0 %2540, %v365_v27  }
  0x2f   : > { %428 = vperm.xlu1 %2543, %v365_v27  }
  0x32   : > { %621 = vperm.xlu0 %2540, %v366_v28  }
  0x33   : > { %433 = vperm.xlu1 %2543, %v366_v28  }
  0x36   : > { %625 = vperm.xlu0 %2540, %v367_v29  }
  0x37   : > { %438 = vperm.xlu1 %2543, %v367_v29   ;;  %v2441_v29 = vpack.c.bf16 %v892_v23, %v891_v22 }
  0x3a   : > { %629 = vperm.xlu0 %2540, %v368_v30  }
  0x3b   : > { %443 = vperm.xlu1 %2543, %v368_v30  }
  0x3e   : > { %633 = vperm.xlu0 %2540, %v369_v31  }
  0x3f   : > { %448 = vperm.xlu1 %2543, %v369_v31  }
  0x42   : > { %637 = vperm.xlu0 %2540, %v370_v35  }
  0x43   : > { %453 = vperm.xlu1 %2543, %v370_v35  }
  0x46   : > { %641 = vperm.xlu0 %2540, %v371_v36  }
  0x47   : > { %458 = vperm.xlu1 %2543, %v371_v36  }
  0x4a   : > { %645 = vperm.xlu0 %2540, %v372_v37  }
  0x4b   : > { %463 = vperm.xlu1 %2543, %v372_v37  }
  0x4e   : > { %649 = vperm.xlu0 %2540, %v373_v38  }
  0x4f   : > { %468 = vperm.xlu1 %2543, %v373_v38  }
  0x52   : > { %653 = vperm.xlu0 %2540, %v374_v39  }
  0x53   : > { %473 = vperm.xlu1 %2543, %v374_v39   ;;  %v2445_v39 = vpack.c.bf16 %v894_v33, %v893_v32 }
  0x56   : > { %657 = vperm.xlu0 %2540, %v375_v40  }
  0x57   : > { %478 = vperm.xlu1 %2543, %v375_v40  }
  0x5a   : > { %661 = vperm.xlu0 %2540, %v376_v41  }
  0x5b   : > { %483 = vperm.xlu1 %2543, %v376_v41  }
  0x5e   : > { %665 = vperm.xlu0 %2540, %v377_v42  }
  0x5f   : > { %488 = vperm.xlu1 %2543, %v377_v42   ;;  %v895_v42 = vld [vmem:[%s3144_s4 + $0x40] sm:$0xff] }
  0x62   : > { %669 = vperm.xlu0 %2540, %v378_v43  }
  0x63   : > { %493 = vperm.xlu1 %2543, %v378_v43   ;;  %v896_v43 = vld [vmem:[%s3144_s4 + $0x48] sm:$0xff] }
  0x66   : > { %673 = vperm.xlu0 %2540, %v379_v44  }
  0x67   : > { %498 = vperm.xlu1 %2543, %v379_v44  }
  0x6a   : > { %677 = vperm.xlu0 %2540, %v380_v45  }
  0x6b   : > { %503 = vperm.xlu1 %2543, %v380_v45  }
  0x6e   : > { %681 = vperm.xlu0 %2540, %v381_v46  }
  0x6f   : > { %508 = vperm.xlu1 %2543, %v381_v46  }
  0x72   : > { %685 = vperm.xlu0 %2540, %v382_v47  }
  0x73   : > { %513 = vperm.xlu1 %2543, %v382_v47  }
  0x76   : > { %689 = vperm.xlu0 %2540, %v383_v48  }
  0x77   : > { %518 = vperm.xlu1 %2543, %v383_v48  }
  0x7a   : > { %693 = vperm.xlu0 %2540, %v384_v49  }
  0x7b   : > { %523 = vperm.xlu1 %2543, %v384_v49   ;;  %v2449_v49 = vpack.c.bf16 %v896_v43, %v895_v42 }
  0x7e   : > { %697 = vperm.xlu0 %2540, %v385_v50  }
  0x7f   : > { %528 = vperm.xlu1 %2543, %v385_v50  }
  0x82   : > { %701 = vperm.xlu0 %2540, %v386_v51  }
  0x83   : > { %533 = vperm.xlu1 %2543, %v386_v51  }
  0x86   : > { %705 = vperm.xlu0 %2540, %v387_v52  }
  0x87   : > { %538 = vperm.xlu1 %2543, %v387_v52  }
  0x8a   : > { %709 = vperm.xlu0 %2540, %v388_v53  }
  0x8b   : > { %543 = vperm.xlu1 %2543, %v388_v53  }
  0x8e   : > { %713 = vperm.xlu0 %2540, %v389_v54  }
  0x8f   : > { %548 = vperm.xlu1 %2543, %v389_v54  }
  0x90   : > { %v399_v55 = vpop.permute.xlu1 %398  ;;  %v394_v56 = vpop.permute.xlu0 %393 }
  0x91   : > { %v556_v61 = vmul.f32 %v2700_v57, %v399_v55  ;;  %v555_v62 = vmul.f32 %v2700_v57, %v394_v56 }
  0x95   : > { %v594_v59 = vpop.permute.xlu1 %593  ;;  %v590_v60 = vpop.permute.xlu0 %589 }
  0x96   : > { %v721_v63 = vmul.f32 %v2705_v58, %v594_v59  ;;  %v720_v0 = vmul.f32 %v2705_v58, %v590_v60 }
  0x98   : > { %v753_v4 = vadd.f32 %v721_v63, %v556_v61  ;;  %v752_v5 = vadd.f32 %v720_v0, %v555_v62 }
  0x99   : > { %v598_v7 = vpop.permute.xlu0 %597 }
  0x9a   : > { %v792_v8 = vadd.f32 %v2714_v1, %v753_v4  ;;  %v722_v9 = vmul.f32 %v2705_v58, %v598_v7  ;;  %v404_v10 = vpop.permute.xlu1 %403  ;;  %v791_v11 = vadd.f32 %v2714_v1, %v752_v5 }
  0x9b   : > { %v557_v14 = vmul.f32 %v2700_v57, %v404_v10 }
  0x9c   : > { %v824_v15 = vmax.f32 %v792_v8, 0.0  ;;  %v823_v16 = vmax.f32 %v791_v11, 0.0 }
  0x9d   : > { %v754_v17 = vadd.f32 %v722_v9, %v557_v14  ;;  %v602_v18 = vpop.permute.xlu0 %601 }
  0x9e   : > { %v723_v20 = vmul.f32 %v2705_v58, %v602_v18  ;;  %v409_v21 = vpop.permute.xlu1 %408  ;;  %2213 = vmatprep.mubr.msk.f32.mxu0 %vm909_vm0, %v823_v16 }
  0x9f   : > { %v793_v24 = vadd.f32 %v2714_v1, %v754_v17  ;;  %v558_v25 = vmul.f32 %v2700_v57, %v409_v21  ;;  %2214 = vmatmul.mubr.msk.f32.vlgmr.msra.gmra.mrb[0].mxu0 %vm909_vm0, %v824_v15 }
  0xa0   : > { %2436 = vmatpush3.bf16.msra.mxu0 %v2674_v34 }
  0xa1   : > { %v825_v26 = vmax.f32 %v793_v24, 0.0  ;;  %v755_v27 = vadd.f32 %v723_v20, %v558_v25  ;;  %v606_v28 = vpop.permute.xlu0 %605  ;;  %2438 = vmatprep.subr.bf16.mxu0 %v2437_v19 }
  0xa2   : > { %v724_v30 = vmul.f32 %v2705_v58, %v606_v28  ;;  %v414_v31 = vpop.permute.xlu1 %413 }
  0xa3   : > { %v794_v35 = vadd.f32 %v2714_v1, %v755_v27  ;;  %v559_v34 = vmul.f32 %v2700_v57, %v414_v31  ;;  %2216 = vmatprep.mubr.msk.f32.mxu0 %vm909_vm0, %v825_v26 }
  0xa4   : > { %2440 = vmatpush3.bf16.msra.mxu0 %v2437_v19 }
  0xa5   : > { %v826_v36 = vmax.f32 %v794_v35, 0.0  ;;  %v756_v37 = vadd.f32 %v724_v30, %v559_v34  ;;  %v610_v38 = vpop.permute.xlu0 %609  ;;  %2442 = vmatprep.subr.bf16.mxu0 %v2441_v29 }
  0xa6   : > { %v725_v40 = vmul.f32 %v2705_v58, %v610_v38  ;;  %v419_v41 = vpop.permute.xlu1 %418 }
  0xa7   : > { %v795_v44 = vadd.f32 %v2714_v1, %v756_v37  ;;  %v560_v45 = vmul.f32 %v2700_v57, %v419_v41  ;;  %2217 = vmatmul.mubr.msk.f32.gmra.mrb[2].mxu0 %vm909_vm0, %v826_v36 }
  0xa8   : > { %2444 = vmatpush3.bf16.msra.mxu0 %v2441_v29 }
  0xa9   : > { %v827_v46 = vmax.f32 %v795_v44, 0.0  ;;  %v757_v47 = vadd.f32 %v725_v40, %v560_v45  ;;  %v614_v48 = vpop.permute.xlu0 %613  ;;  %2446 = vmatprep.subr.bf16.mxu0 %v2445_v39 }
  0xaa   : > { %v726_v50 = vmul.f32 %v2705_v58, %v614_v48  ;;  %v424_v51 = vpop.permute.xlu1 %423 }
  0xab   : > { %v796_v52 = vadd.f32 %v2714_v1, %v757_v47  ;;  %v561_v53 = vmul.f32 %v2700_v57, %v424_v51  ;;  %2219 = vmatprep.mubr.msk.f32.mxu0 %vm909_vm0, %v827_v46 }
  0xac   : > { %2448 = vmatpush3.bf16.msra.mxu0 %v2445_v39 }
  0xad   : > { %v828_v54 = vmax.f32 %v796_v52, 0.0  ;;  %v758_v55 = vadd.f32 %v726_v50, %v561_v53  ;;  %v618_v56 = vpop.permute.xlu0 %617  ;;  %2450 = vmatprep.subr.bf16.mxu0 %v2449_v49 }
  0xae   : > { %v727_v59 = vmul.f32 %v2705_v58, %v618_v56  ;;  %v429_v60 = vpop.permute.xlu1 %428 }
  0xaf   : > { %v797_v61 = vadd.f32 %v2714_v1, %v758_v55  ;;  %v562_v62 = vmul.f32 %v2700_v57, %v429_v60  ;;  %2220 = vmatmul.mubr.msk.f32.gmra.mrb[4].mxu0 %vm909_vm0, %v828_v54 }
  0xb0   : > { %2452 = vmatpush3.bf16.msra.mxu0 %v2449_v49 }
  0xb1   : > { %v829_v63 = vmax.f32 %v797_v61, 0.0  ;;  %v759_v0 = vadd.f32 %v727_v59, %v562_v62  ;;  %v622_v2 = vpop.permute.xlu0 %621 }
  0xb2   : > { %v728_v3 = vmul.f32 %v2705_v58, %v622_v2  ;;  %v434_v4 = vpop.permute.xlu1 %433 }
  0xb3   : > { %v798_v5 = vadd.f32 %v2714_v1, %v759_v0  ;;  %v563_v7 = vmul.f32 %v2700_v57, %v434_v4  ;;  %2222 = vmatprep.mubr.msk.f32.mxu0 %vm909_vm0, %v829_v63 }
  0xb5   : > { %v830_v8 = vmax.f32 %v798_v5, 0.0  ;;  %v760_v9 = vadd.f32 %v728_v3, %v563_v7  ;;  %v626_v10 = vpop.permute.xlu0 %625  ;;  %v855_v7 = vld [vmem:[%s2812_s14] sm:$0xff] }
  0xb6   : > { %v729_v11 = vmul.f32 %v2705_v58, %v626_v10  ;;  %v439_v12 = vpop.permute.xlu1 %438 }
  0xb7   : > { %v799_v13 = vadd.f32 %v2714_v1, %v760_v9  ;;  %v564_v14 = vmul.f32 %v2700_v57, %v439_v12  ;;  %2223 = vmatmul.mubr.msk.f32.gmra.mrb[6].mxu0 %vm909_vm0, %v830_v8  ;;  %v856_v12 = vld [vmem:[%s2812_s14 + $0x8] sm:$0xff] }
  0xb9   : > { %v831_v15 = vmax.f32 %v799_v13, 0.0  ;;  %v761_v16 = vadd.f32 %v729_v11, %v564_v14  ;;  %v630_v17 = vpop.permute.xlu0 %629 }
  0xba   : > { %v730_v18 = vmul.f32 %v2705_v58, %v630_v17  ;;  %v444_v19 = vpop.permute.xlu1 %443 }
  0xbb   : > { %v800_v20 = vadd.f32 %v2714_v1, %v761_v16  ;;  %v565_v21 = vmul.f32 %v2700_v57, %v444_v19  ;;  %2225 = vmatprep.mubr.msk.f32.mxu0 %vm909_vm0, %v831_v15  ;;  %v857_v16 = vld [vmem:[%s2812_s14 + $0x10] sm:$0xff] }
  0xbc   : > { %v1626_v19 = vld [vmem:[%s3147_s7 + $0x10] sm:$0xff] }
  0xbd   : > { %v832_v22 = vmax.f32 %v800_v20, 0.0  ;;  %v762_v23 = vadd.f32 %v730_v18, %v565_v21  ;;  %v634_v24 = vpop.permute.xlu0 %633  ;;  %v1627_v20 = vld [vmem:[%s3147_s7 + $0x18] sm:$0xff] }
  0xbe   : > { %v731_v25 = vmul.f32 %v2705_v58, %v634_v24  ;;  %v449_v26 = vpop.permute.xlu1 %448 }
  0xbf   : > { %v801_v27 = vadd.f32 %v2714_v1, %v762_v23  ;;  %v566_v28 = vmul.f32 %v2700_v57, %v449_v26  ;;  %2226 = vmatmul.mubr.msk.f32.gmra.mrb[8].mxu0 %vm909_vm0, %v832_v22  ;;  %v858_v23 = vld [vmem:[%s2812_s14 + $0x18] sm:$0xff] }
  0xc1   : > { %v833_v29 = vmax.f32 %v801_v27, 0.0  ;;  %v763_v30 = vadd.f32 %v731_v25, %v566_v28  ;;  %v638_v31 = vpop.permute.xlu0 %637  ;;  %v859_v27 = vld [vmem:[%s2812_s14 + $0x20] sm:$0xff]  ;;  %v2457_v28 = vpack.c.bf16 %v1627_v20, %v1626_v19  ;;  %v1637_v19 = vld [vmem:[%s3147_s7 + $0x68] sm:$0xff] }
  0xc2   : > { %v732_v32 = vmul.f32 %v2705_v58, %v638_v31  ;;  %v454_v33 = vpop.permute.xlu1 %453  ;;  %v1628_v31 = vld [vmem:[%s3147_s7 + $0x20] sm:$0xff] }
  0xc3   : > { %v802_v35 = vadd.f32 %v2714_v1, %v763_v30  ;;  %v567_v34 = vmul.f32 %v2700_v57, %v454_v33  ;;  %2228 = vmatprep.mubr.msk.f32.mxu0 %vm909_vm0, %v833_v29 }
  0xc5   : > { %v834_v36 = vmax.f32 %v802_v35, 0.0  ;;  %v764_v37 = vadd.f32 %v732_v32, %v567_v34  ;;  %v642_v38 = vpop.permute.xlu0 %641  ;;  %v1629_v32 = vld [vmem:[%s3147_s7 + $0x28] sm:$0xff] }
  0xc6   : > { %v733_v39 = vmul.f32 %v2705_v58, %v642_v38  ;;  %v459_v40 = vpop.permute.xlu1 %458  ;;  %v860_v34 = vld [vmem:[%s2812_s14 + $0x28] sm:$0xff] }
  0xc7   : > { %v803_v41 = vadd.f32 %v2714_v1, %v764_v37  ;;  %v568_v42 = vmul.f32 %v2700_v57, %v459_v40  ;;  %2229 = vmatmul.mubr.msk.f32.gmra.mrb[10].mxu0 %vm909_vm0, %v834_v36  ;;  %v2461_v40 = vpack.c.bf16 %v1629_v32, %v1628_v31  ;;  %v870_v32 = vld [vmem:[%s2812_s14 + $0x78] sm:$0xff] }
  0xc9   : > { %v835_v43 = vmax.f32 %v803_v41, 0.0  ;;  %v765_v44 = vadd.f32 %v733_v39, %v568_v42  ;;  %v646_v45 = vpop.permute.xlu0 %645  ;;  %v861_v39 = vld [vmem:[%s2812_s14 + $0x30] sm:$0xff] }
  0xca   : > { %v734_v46 = vmul.f32 %v2705_v58, %v646_v45  ;;  %v464_v47 = vpop.permute.xlu1 %463 }
  0xcb   : > { %v804_v48 = vadd.f32 %v2714_v1, %v765_v44  ;;  %v569_v49 = vmul.f32 %v2700_v57, %v464_v47  ;;  %2231 = vmatprep.mubr.msk.f32.mxu0 %vm909_vm0, %v835_v43  ;;  %v1630_v43 = vld [vmem:[%s3147_s7 + $0x30] sm:$0xff]  ;;  %v1631_v44 = vld [vmem:[%s3147_s7 + $0x38] sm:$0xff] }
  0xcd   : > { %v836_v50 = vmax.f32 %v804_v48, 0.0  ;;  %v766_v51 = vadd.f32 %v734_v46, %v569_v49  ;;  %v650_v52 = vpop.permute.xlu0 %649  ;;  %v862_v46 = vld [vmem:[%s2812_s14 + $0x38] sm:$0xff] }
  0xce   : > { %v735_v53 = vmul.f32 %v2705_v58, %v650_v52  ;;  %v469_v54 = vpop.permute.xlu1 %468 }
  0xcf   : > { %v805_v55 = vadd.f32 %v2714_v1, %v766_v51  ;;  %v570_v56 = vmul.f32 %v2700_v57, %v469_v54  ;;  %2232 = vmatmul.mubr.msk.f32.gmra.mrb[12].mxu0 %vm909_vm0, %v836_v50  ;;  %v863_v50 = vld [vmem:[%s2812_s14 + $0x40] sm:$0xff]  ;;  %v2465_v51 = vpack.c.bf16 %v1631_v44, %v1630_v43 }
  0xd0   : > { %v1632_v54 = vld [vmem:[%s3147_s7 + $0x40] sm:$0xff] }
  0xd1   : > { %v837_v59 = vmax.f32 %v805_v55, 0.0  ;;  %v767_v60 = vadd.f32 %v735_v53, %v570_v56  ;;  %v654_v61 = vpop.permute.xlu0 %653  ;;  %v1633_v55 = vld [vmem:[%s3147_s7 + $0x48] sm:$0xff] }
  0xd2   : > { %v736_v62 = vmul.f32 %v2705_v58, %v654_v61  ;;  %v474_v63 = vpop.permute.xlu1 %473 }
  0xd3   : > { %v806_v0 = vadd.f32 %v2714_v1, %v767_v60  ;;  %v571_v2 = vmul.f32 %v2700_v57, %v474_v63  ;;  %2234 = vmatprep.mubr.msk.f32.mxu0 %vm909_vm0, %v837_v59  ;;  %v864_v60 = vld [vmem:[%s2812_s14 + $0x48] sm:$0xff] }
  0xd5   : > { %v838_v3 = vmax.f32 %v806_v0, 0.0  ;;  %v768_v4 = vadd.f32 %v736_v62, %v571_v2  ;;  %v658_v5 = vpop.permute.xlu0 %657  ;;  %v865_v0 = vld [vmem:[%s2812_s14 + $0x50] sm:$0xff]  ;;  %v2469_v2 = vpack.c.bf16 %v1633_v55, %v1632_v54 }
  0xd6   : > { %v737_v8 = vmul.f32 %v2705_v58, %v658_v5  ;;  %v479_v9 = vpop.permute.xlu1 %478  ;;  %v1634_v5 = vld [vmem:[%s3147_s7 + $0x50] sm:$0xff] }
  0xd7   : > { %v572_v10 = vmul.f32 %v2700_v57, %v479_v9  ;;  %2235 = vmatmul.mubr.msk.f32.gmra.mrb[14].mxu0 %vm909_vm0, %v838_v3  ;;  %v807_v11 = vadd.f32 %v2714_v1, %v768_v4 }
  0xd8   : > { %2281 = vmatprep.mubr.msk.f32.mxu0 %vm1231_vm1, %v855_v7  ;;  %v1635_v7 = vld [vmem:[%s3147_s7 + $0x58] sm:$0xff] }
  0xd9   : > { %v769_v13 = vadd.f32 %v737_v8, %v572_v10  ;;  %v662_v14 = vpop.permute.xlu0 %661  ;;  %v839_v15 = vmax.f32 %v807_v11, 0.0  ;;  %v866_v10 = vld [vmem:[%s2812_s14 + $0x58] sm:$0xff] }
  0xda   : > { %v738_v17 = vmul.f32 %v2705_v58, %v662_v14  ;;  %v484_v18 = vpop.permute.xlu1 %483  ;;  %v867_v14 = vld [vmem:[%s2812_s14 + $0x60] sm:$0xff] }
  0xdb   : > { %v808_v21 = vadd.f32 %v2714_v1, %v769_v13  ;;  %v573_v22 = vmul.f32 %v2700_v57, %v484_v18  ;;  %2237 = vmatprep.mubr.msk.f32.mxu1 %vm909_vm0, %v839_v15  ;;  %2282 = vmatmul.mubr.msk.f32.vlgmr.msra.gmra.mrb[0].mxu0 %vm1231_vm1, %v856_v12  ;;  %v2473_v15 = vpack.c.bf16 %v1635_v7, %v1634_v5  ;;  %v1636_v18 = vld [vmem:[%s3147_s7 + $0x60] sm:$0xff]  ;;  %v878_v7 = vld [vmem:[%s2812_s14 + $0xb8] sm:$0xff] }
  0xdc   : > { %2284 = vmatprep.mubr.msk.f32.mxu0 %vm1231_vm1, %v857_v16 }
  0xdd   : > { %v840_v24 = vmax.f32 %v808_v21, 0.0  ;;  %v770_v25 = vadd.f32 %v738_v17, %v573_v22  ;;  %v666_v26 = vpop.permute.xlu0 %665  ;;  %v868_v22 = vld [vmem:[%s2812_s14 + $0x68] sm:$0xff] }
  0xde   : > { %v739_v29 = vmul.f32 %v2705_v58, %v666_v26  ;;  %v489_v30 = vpop.permute.xlu1 %488  ;;  %v869_v26 = vld [vmem:[%s2812_s14 + $0x70] sm:$0xff] }
  0xdf   : > { %v809_v33 = vadd.f32 %v2714_v1, %v770_v25  ;;  %v574_v35 = vmul.f32 %v2700_v57, %v489_v30  ;;  %2238 = vmatmul.mubr.msk.f32.vlgmr.msra.gmra.mrb[0].mxu1 %vm909_vm0, %v840_v24  ;;  %2285 = vmatmul.mubr.msk.f32.gmra.mrb[2].mxu0 %vm1231_vm1, %v858_v23 }
  0xe0   : > { %2287 = vmatprep.mubr.msk.f32.mxu0 %vm1231_vm1, %v859_v27  ;;  %2456 = vmatpush3.bf16.msra.mxu1 %v2722_v6  ;;  %v2477_v27 = vpack.c.bf16 %v1637_v19, %v1636_v18 }
  0xe1   : > { %v841_v36 = vmax.f32 %v809_v33, 0.0  ;;  %v771_v37 = vadd.f32 %v739_v29, %v574_v35  ;;  %v670_v38 = vpop.permute.xlu0 %669  ;;  %2458 = vmatprep.subr.bf16.mxu1 %v2457_v28 }
  0xe2   : > { %v740_v41 = vmul.f32 %v2705_v58, %v670_v38  ;;  %v494_v42 = vpop.permute.xlu1 %493 }
  0xe3   : > { %v810_v6 = vadd.f32 %v2714_v1, %v771_v37  ;;  %v575_v45 = vmul.f32 %v2700_v57, %v494_v42  ;;  %2240 = vmatprep.mubr.msk.f32.mxu1 %vm909_vm0, %v841_v36  ;;  %2288 = vmatmul.mubr.msk.f32.gmra.mrb[4].mxu0 %vm1231_vm1, %v860_v34  ;;  %v871_v36 = vld [vmem:[%s2812_s14 + $0x80] sm:$0xff] }
  0xe4   : > { %2290 = vmatprep.mubr.msk.f32.mxu0 %vm1231_vm1, %v861_v39  ;;  %2460 = vmatpush3.bf16.msra.mxu1 %v2457_v28 }
  0xe5   : > { %v842_v47 = vmax.f32 %v810_v6, 0.0  ;;  %v772_v48 = vadd.f32 %v740_v41, %v575_v45  ;;  %v674_v49 = vpop.permute.xlu0 %673  ;;  %2462 = vmatprep.subr.bf16.mxu1 %v2461_v40  ;;  %v872_v41 = vld [vmem:[%s2812_s14 + $0x88] sm:$0xff]  ;;  %v873_v6 = vld [vmem:[%s2812_s14 + $0x90] sm:$0xff] }
  0xe6   : > { %v741_v52 = vmul.f32 %v2705_v58, %v674_v49  ;;  %v499_v53 = vpop.permute.xlu1 %498  ;;  %v874_v49 = vld [vmem:[%s2812_s14 + $0x98] sm:$0xff] }
  0xe7   : > { %v811_v56 = vadd.f32 %v2714_v1, %v772_v48  ;;  %v576_v59 = vmul.f32 %v2700_v57, %v499_v53  ;;  %2241 = vmatmul.mubr.msk.f32.gmra.mrb[2].mxu1 %vm909_vm0, %v842_v47  ;;  %2291 = vmatmul.mubr.msk.f32.gmra.mrb[6].mxu0 %vm1231_vm1, %v862_v46  ;;  %v875_v53 = vld [vmem:[%s2812_s14 + $0xa0] sm:$0xff] }
  0xe8   : > { %2293 = vmatprep.mubr.msk.f32.mxu0 %vm1231_vm1, %v863_v50  ;;  %2464 = vmatpush3.bf16.msra.mxu1 %v2461_v40 }
  0xe9   : > { %v843_v61 = vmax.f32 %v811_v56, 0.0  ;;  %v773_v62 = vadd.f32 %v741_v52, %v576_v59  ;;  %v678_v63 = vpop.permute.xlu0 %677  ;;  %2466 = vmatprep.subr.bf16.mxu1 %v2465_v51 }
  0xea   : > { %v742_v3 = vmul.f32 %v2705_v58, %v678_v63  ;;  %v504_v4 = vpop.permute.xlu1 %503 }
  0xeb   : > { %v812_v8 = vadd.f32 %v2714_v1, %v773_v62  ;;  %v577_v9 = vmul.f32 %v2700_v57, %v504_v4  ;;  %2243 = vmatprep.mubr.msk.f32.mxu1 %vm909_vm0, %v843_v61  ;;  %2294 = vmatmul.mubr.msk.f32.gmra.mrb[8].mxu0 %vm1231_vm1, %v864_v60  ;;  %v876_v60 = vld [vmem:[%s2812_s14 + $0xa8] sm:$0xff] }
  0xec   : > { %2296 = vmatprep.mubr.msk.f32.mxu0 %vm1231_vm1, %v865_v0  ;;  %2468 = vmatpush3.bf16.msra.mxu1 %v2465_v51  ;;  %v877_v0 = vld [vmem:[%s2812_s14 + $0xb0] sm:$0xff] }
  0xed   : > { %v844_v11 = vmax.f32 %v812_v8, 0.0  ;;  %v774_v12 = vadd.f32 %v742_v3, %v577_v9  ;;  %v682_v13 = vpop.permute.xlu0 %681  ;;  %2470 = vmatprep.subr.bf16.mxu1 %v2469_v2 }
  0xee   : > { %v743_v16 = vmul.f32 %v2705_v58, %v682_v13  ;;  %v509_v17 = vpop.permute.xlu1 %508 }
  0xef   : > { %v813_v20 = vadd.f32 %v2714_v1, %v774_v12  ;;  %v578_v21 = vmul.f32 %v2700_v57, %v509_v17  ;;  %2244 = vmatmul.mubr.msk.f32.gmra.mrb[4].mxu1 %vm909_vm0, %v844_v11  ;;  %2297 = vmatmul.mubr.msk.f32.gmra.mrb[10].mxu0 %vm1231_vm1, %v866_v10  ;;  %v879_v11 = vld [vmem:[%s2812_s14 + $0xc0] sm:$0xff] }
  0xf0   : > { %2299 = vmatprep.mubr.msk.f32.mxu0 %vm1231_vm1, %v867_v14  ;;  %2472 = vmatpush3.bf16.msra.mxu1 %v2469_v2 }
  0xf1   : > { %v845_v23 = vmax.f32 %v813_v20, 0.0  ;;  %v775_v24 = vadd.f32 %v743_v16, %v578_v21  ;;  %v686_v25 = vpop.permute.xlu0 %685  ;;  %2474 = vmatprep.subr.bf16.mxu1 %v2473_v15  ;;  %v880_v16 = vld [vmem:[%s2812_s14 + $0xc8] sm:$0xff]  ;;  %v881_v20 = vld [vmem:[%s2812_s14 + $0xd0] sm:$0xff] }
  0xf2   : > { %v744_v28 = vmul.f32 %v2705_v58, %v686_v25  ;;  %v514_v29 = vpop.permute.xlu1 %513  ;;  %v882_v25 = vld [vmem:[%s2812_s14 + $0xd8] sm:$0xff] }
  0xf3   : > { %v814_v30 = vadd.f32 %v2714_v1, %v775_v24  ;;  %v579_v31 = vmul.f32 %v2700_v57, %v514_v29  ;;  %2246 = vmatprep.mubr.msk.f32.mxu1 %vm909_vm0, %v845_v23  ;;  %2300 = vmatmul.mubr.msk.f32.gmra.mrb[12].mxu0 %vm1231_vm1, %v868_v22  ;;  %v883_v29 = vld [vmem:[%s2812_s14 + $0xe0] sm:$0xff] }
  0xf4   : > { %2302 = vmatprep.mubr.msk.f32.mxu0 %vm1231_vm1, %v869_v26  ;;  %2476 = vmatpush3.bf16.msra.mxu1 %v2473_v15 }
  0xf5   : > { %v846_v33 = vmax.f32 %v814_v30, 0.0  ;;  %v776_v35 = vadd.f32 %v744_v28, %v579_v31  ;;  %v690_v34 = vpop.permute.xlu0 %689  ;;  %2478 = vmatprep.subr.bf16.mxu1 %v2477_v27 }
  0xf6   : > { %v745_v37 = vmul.f32 %v2705_v58, %v690_v34  ;;  %v519_v38 = vpop.permute.xlu1 %518 }
  0xf7   : > { %v815_v39 = vadd.f32 %v2714_v1, %v776_v35  ;;  %v580_v40 = vmul.f32 %v2700_v57, %v519_v38  ;;  %2247 = vmatmul.mubr.msk.f32.gmra.mrb[6].mxu1 %vm909_vm0, %v846_v33  ;;  %2303 = vmatmul.mubr.msk.f32.gmra.mrb[14].mxu0 %vm1231_vm1, %v870_v32  ;;  %v884_v35 = vld [vmem:[%s2812_s14 + $0xe8] sm:$0xff] }
  0xf8   : > { %2305 = vmatprep.mubr.msk.f32.mxu0 %vm1231_vm1, %v871_v36  ;;  %2480 = vmatpush3.bf16.msra.mxu1 %v2477_v27 }
  0xf9   : > { %v847_v42 = vmax.f32 %v815_v39, 0.0  ;;  %v777_v43 = vadd.f32 %v745_v37, %v580_v40  ;;  %v694_v44 = vpop.permute.xlu0 %693  ;;  %v885_v37 = vld [vmem:[%s2812_s14 + $0xf0] sm:$0xff] }
  0xfa   : > { %v746_v45 = vmul.f32 %v2705_v58, %v694_v44  ;;  %v524_v46 = vpop.permute.xlu1 %523  ;;  %v1638_v39 = vld [vmem:[%s3147_s7 + $0x70] sm:$0xff] }
  0xfb   : > { %v816_v47 = vadd.f32 %v2714_v1, %v777_v43  ;;  %v581_v48 = vmul.f32 %v2700_v57, %v524_v46  ;;  %2249 = vmatprep.mubr.msk.f32.mxu1 %vm909_vm0, %v847_v42  ;;  %2306 = vmatmul.mubr.msk.f32.gmra.mrb[16].mxu0 %vm1231_vm1, %v872_v41  ;;  %v2990_v41 = vld [vmem:[%s3146_s6] ss:$0 sm:$0xff] }
  0xfc   : > { %2308 = vmatprep.mubr.msk.f32.mxu0 %vm1231_vm1, %v873_v6 }
  0xfd   : > { %v848_v50 = vmax.f32 %v816_v47, 0.0  ;;  %v778_v51 = vadd.f32 %v746_v45, %v581_v48  ;;  %v698_v52 = vpop.permute.xlu0 %697 }
  0xfe   : > { %v747_v54 = vmul.f32 %v2705_v58, %v698_v52  ;;  %v529_v55 = vpop.permute.xlu1 %528 }
  0xff   : > { %v817_v56 = vadd.f32 %v2714_v1, %v778_v51  ;;  %v582_v59 = vmul.f32 %v2700_v57, %v529_v55  ;;  %2250 = vmatmul.mubr.msk.f32.gmra.mrb[8].mxu1 %vm909_vm0, %v848_v50  ;;  %2309 = vmatmul.mubr.msk.f32.gmra.mrb[18].mxu0 %vm1231_vm1, %v874_v49 }
 0x100   : > { %2311 = vmatprep.mubr.msk.f32.mxu0 %vm1231_vm1, %v875_v53 }
 0x101   : > { %v849_v61 = vmax.f32 %v817_v56, 0.0  ;;  %v779_v62 = vadd.f32 %v747_v54, %v582_v59  ;;  %v702_v63 = vpop.permute.xlu0 %701 }
 0x102   : > { %v748_v2 = vmul.f32 %v2705_v58, %v702_v63  ;;  %v534_v3 = vpop.permute.xlu1 %533 }
 0x103   : > { %v818_v4 = vadd.f32 %v2714_v1, %v779_v62  ;;  %v583_v5 = vmul.f32 %v2700_v57, %v534_v3  ;;  %2252 = vmatprep.mubr.msk.f32.mxu1 %vm909_vm0, %v849_v61  ;;  %2312 = vmatmul.mubr.msk.f32.gmra.mrb[20].mxu0 %vm1231_vm1, %v876_v60 }
 0x104   : > { %2314 = vmatprep.mubr.msk.f32.mxu0 %vm1231_vm1, %v877_v0 }
 0x105   : > { %v850_v8 = vmax.f32 %v818_v4, 0.0  ;;  %v780_v9 = vadd.f32 %v748_v2, %v583_v5  ;;  %v706_v10 = vpop.permute.xlu0 %705 }
 0x106   : > { %v749_v12 = vmul.f32 %v2705_v58, %v706_v10  ;;  %v539_v13 = vpop.permute.xlu1 %538 }
 0x107   : > { %v819_v14 = vadd.f32 %v2714_v1, %v780_v9  ;;  %v584_v15 = vmul.f32 %v2700_v57, %v539_v13  ;;  %2253 = vmatmul.mubr.msk.f32.gmra.mrb[10].mxu1 %vm909_vm0, %v850_v8  ;;  %2315 = vmatmul.mubr.msk.f32.gmra.mrb[22].mxu0 %vm1231_vm1, %v878_v7 }
 0x108   : > { %2317 = vmatprep.mubr.msk.f32.mxu0 %vm1231_vm1, %v879_v11 }
 0x109   : > { %v851_v17 = vmax.f32 %v819_v14, 0.0  ;;  %v781_v18 = vadd.f32 %v749_v12, %v584_v15  ;;  %v710_v19 = vpop.permute.xlu0 %709 }
 0x10a   : > { %v750_v21 = vmul.f32 %v2705_v58, %v710_v19  ;;  %v544_v22 = vpop.permute.xlu1 %543 }
 0x10b   : > { %v820_v23 = vadd.f32 %v2714_v1, %v781_v18  ;;  %v585_v24 = vmul.f32 %v2700_v57, %v544_v22  ;;  %2255 = vmatprep.mubr.msk.f32.mxu1 %vm909_vm0, %v851_v17  ;;  %2318 = vmatmul.mubr.msk.f32.gmra.mrb[24].mxu0 %vm1231_vm1, %v880_v16 }
 0x10c   : > { %2320 = vmatprep.mubr.msk.f32.mxu0 %vm1231_vm1, %v881_v20 }
 0x10d   : > { %v852_v26 = vmax.f32 %v820_v23, 0.0  ;;  %v782_v27 = vadd.f32 %v750_v21, %v585_v24  ;;  %v714_v28 = vpop.permute.xlu0 %713 }
 0x10e   : > { %v751_v30 = vmul.f32 %v2705_v58, %v714_v28  ;;  %v549_v31 = vpop.permute.xlu1 %548  ;;  %v886_v58 = vld [vmem:[%s2812_s14 + $0xf8] sm:$0xff] }
 0x10f   : > { %v821_v32 = vadd.f32 %v2714_v1, %v782_v27  ;;  %v586_v33 = vmul.f32 %v2700_v57, %v549_v31  ;;  %2256 = vmatmul.mubr.msk.f32.gmra.mrb[12].mxu1 %vm909_vm0, %v852_v26  ;;  %2321 = vmatmul.mubr.msk.f32.gmra.mrb[26].mxu0 %vm1231_vm1, %v882_v25 }
 0x110   : > { %2323 = vmatprep.mubr.msk.f32.mxu0 %vm1231_vm1, %v883_v29 }
 0x111   : > { %v853_v34 = vmax.f32 %v821_v32, 0.0  ;;  %v783_v36 = vadd.f32 %v751_v30, %v586_v33 }
 0x113   : > { %v822_v38 = vadd.f32 %v2714_v1, %v783_v36  ;;  %2258 = vmatprep.mubr.msk.f32.mxu1 %vm909_vm0, %v853_v34  ;;  %2324 = vmatmul.mubr.msk.f32.gmra.mrb[28].mxu0 %vm1231_vm1, %v884_v35  ;;  %v1639_v1 = vld [vmem:[%s3147_s7 + $0x78] sm:$0xff] }
 0x114   : > { %2326 = vmatprep.mubr.msk.f32.mxu0 %vm1231_vm1, %v885_v37  ;;  %v2481_v40 = vpack.c.bf16 %v1639_v1, %v1638_v39 }
 0x115   : > { %v854_v57 = vmax.f32 %v822_v38, 0.0 }
 0x116   : > { %2482 = vmatprep.subr.bf16.mxu1 %v2481_v40 }
 0x117   : > { %2259 = vmatmul.mubr.msk.f32.gmra.mrb[14].mxu1 %vm909_vm0, %v854_v57  ;;  %2327 = vmatmul.mubr.msk.f32.gmra.mrb[30].mxu0 %vm1231_vm1, %v886_v58 }
 0x118   : > { %2484 = vmatpush3.bf16.msra.mxu1 %v2481_v40 }
 0x1ae   : > { %v2283_v42 = vpop.f32.mrb[0].mxu0 }
 0x1af   : > { %v1561_v43 = vadd.f32 %v2283_v42, %v2990_v41  ;;  %v1394_v44 = vpop.f32.mrb[1].mxu0 }
 0x1b0   : > { %v1560_v6 = vadd.f32 %v2990_v41, %v1394_v44 }
 0x1b1   : > { %v1593_v48 = vmax.f32 %v1561_v43, 0.0 }
 0x1b2   : > { %v1592_v45 = vmax.f32 %v1560_v6, 0.0  ;;  %v2994_v46 = vpop.f32.mrb[0].mxu1  ;;  %v2286_v47 = vpop.f32.mrb[2].mxu0 }
 0x1b3   : > { %v1563_v49 = vadd.f32 %v2286_v47, %v2990_v41  ;;  %v2997_v50 = vpop.f32.mrb[1].mxu1  ;;  %v1404_v51 = vpop.f32.mrb[3].mxu0 }
 0x1b4   : > { %v1562_v52 = vadd.f32 %v2990_v41, %v1404_v51  ;;  %2361 = vmatprep.mubr.f32.mxu1 %v1592_v45 }
 0x1b5   : > { %2362 = vmatmul.mubr.f32.vlgmr.msra.gmra.mrb[16].mxu1 %v1593_v48  ;;  %v1595_v55 = vmax.f32 %v1563_v49, 0.0 }
 0x1b6   : > { %v1594_v53 = vmax.f32 %v1562_v52, 0.0  ;;  %v2289_v54 = vpop.f32.mrb[4].mxu0 }
 0x1b7   : > { %v1565_v56 = vadd.f32 %v2289_v54, %v2990_v41  ;;  %v1414_v59 = vpop.f32.mrb[5].mxu0 }
 0x1b8   : > { %v1564_v60 = vadd.f32 %v2990_v41, %v1414_v59  ;;  %2364 = vmatprep.mubr.f32.mxu1 %v1594_v53 }
 0x1b9   : > { %2365 = vmatmul.mubr.f32.gmra.mrb[18].mxu1 %v1595_v55  ;;  %v1597_v0 = vmax.f32 %v1565_v56, 0.0 }
 0x1ba   : > { %v1596_v61 = vmax.f32 %v1564_v60, 0.0  ;;  %v2242_v62 = vpop.f32.mrb[2].mxu1  ;;  %v2292_v63 = vpop.f32.mrb[6].mxu0 }
 0x1bb   : > { %v1567_v2 = vadd.f32 %v2292_v63, %v2990_v41  ;;  %v1162_v3 = vpop.f32.mrb[3].mxu1  ;;  %v1424_v4 = vpop.f32.mrb[7].mxu0 }
 0x1bc   : > { %v1566_v5 = vadd.f32 %v2990_v41, %v1424_v4  ;;  %2367 = vmatprep.mubr.f32.mxu1 %v1596_v61 }
 0x1bd   : > { %2368 = vmatmul.mubr.f32.gmra.mrb[20].mxu1 %v1597_v0  ;;  %v1599_v9 = vmax.f32 %v1567_v2, 0.0 }
 0x1be   : > { %v1598_v7 = vmax.f32 %v1566_v5, 0.0  ;;  %v2295_v8 = vpop.f32.mrb[8].mxu0 }
 0x1bf   : > { %v1569_v10 = vadd.f32 %v2295_v8, %v2990_v41  ;;  %v1434_v11 = vpop.f32.mrb[9].mxu0 }
 0x1c0   : > { %v1568_v12 = vadd.f32 %v2990_v41, %v1434_v11  ;;  %2370 = vmatprep.mubr.f32.mxu1 %v1598_v7 }
 0x1c1   : > { %2371 = vmatmul.mubr.f32.gmra.mrb[22].mxu1 %v1599_v9  ;;  %v1601_v16 = vmax.f32 %v1569_v10, 0.0 }
 0x1c2   : > { %v1600_v13 = vmax.f32 %v1568_v12, 0.0  ;;  %v2245_v14 = vpop.f32.mrb[4].mxu1  ;;  %v2298_v15 = vpop.f32.mrb[10].mxu0 }
 0x1c3   : > { %v1571_v17 = vadd.f32 %v2298_v15, %v2990_v41  ;;  %v1172_v18 = vpop.f32.mrb[5].mxu1  ;;  %v1444_v19 = vpop.f32.mrb[11].mxu0 }
 0x1c4   : > { %v1570_v20 = vadd.f32 %v2990_v41, %v1444_v19  ;;  %2373 = vmatprep.mubr.f32.mxu1 %v1600_v13 }
 0x1c5   : > { %2374 = vmatmul.mubr.f32.gmra.mrb[24].mxu1 %v1601_v16  ;;  %v1603_v23 = vmax.f32 %v1571_v17, 0.0 }
 0x1c6   : > { %v1602_v21 = vmax.f32 %v1570_v20, 0.0  ;;  %v2301_v22 = vpop.f32.mrb[12].mxu0 }
 0x1c7   : > { %v1573_v24 = vadd.f32 %v2301_v22, %v2990_v41  ;;  %v1454_v25 = vpop.f32.mrb[13].mxu0 }
 0x1c8   : > { %v1572_v26 = vadd.f32 %v2990_v41, %v1454_v25  ;;  %2376 = vmatprep.mubr.f32.mxu1 %v1602_v21 }
 0x1c9   : > { %2377 = vmatmul.mubr.f32.gmra.mrb[26].mxu1 %v1603_v23  ;;  %v1605_v30 = vmax.f32 %v1573_v24, 0.0 }
 0x1ca   : > { %v1604_v27 = vmax.f32 %v1572_v26, 0.0  ;;  %v2248_v28 = vpop.f32.mrb[6].mxu1  ;;  %v2304_v29 = vpop.f32.mrb[14].mxu0 }
 0x1cb   : > { %v1575_v31 = vadd.f32 %v2304_v29, %v2990_v41  ;;  %v1182_v32 = vpop.f32.mrb[7].mxu1  ;;  %v1464_v33 = vpop.f32.mrb[15].mxu0 }
 0x1cc   : > { %v1574_v35 = vadd.f32 %v2990_v41, %v1464_v33  ;;  %2379 = vmatprep.mubr.f32.mxu1 %v1604_v27 }
 0x1cd   : > { %2380 = vmatmul.mubr.f32.gmra.mrb[28].mxu1 %v1605_v30  ;;  %v1607_v37 = vmax.f32 %v1575_v31, 0.0 }
 0x1ce   : > { %v1606_v34 = vmax.f32 %v1574_v35, 0.0  ;;  %v2307_v36 = vpop.f32.mrb[16].mxu0 }
 0x1cf   : > { %v1480_v38 = vadd.f32 %v2307_v36, %v2994_v46  ;;  %v1474_v58 = vpop.f32.mrb[17].mxu0 }
 0x1d0   : > { %v1475_v57 = vadd.f32 %v1474_v58, %v2997_v50  ;;  %2382 = vmatprep.mubr.f32.mxu1 %v1606_v34 }
 0x1d1   : > { %v1577_v39 = vadd.f32 %v2990_v41, %v1480_v38  ;;  %2383 = vmatmul.mubr.f32.gmra.mrb[30].mxu1 %v1607_v37 }
 0x1d2   : > { %v1576_v1 = vadd.f32 %v2990_v41, %v1475_v57  ;;  %v2251_v40 = vpop.f32.mrb[8].mxu1  ;;  %v2310_v42 = vpop.f32.mrb[18].mxu0 }
 0x1d3   : > { %v1490_v43 = vadd.f32 %v2310_v42, %v2242_v62  ;;  %v1192_v44 = vpop.f32.mrb[9].mxu1  ;;  %v1484_v6 = vpop.f32.mrb[19].mxu0  ;;  %v1609_v48 = vmax.f32 %v1577_v39, 0.0 }
 0x1d4   : > { %v1608_v45 = vmax.f32 %v1576_v1, 0.0  ;;  %v1485_v47 = vadd.f32 %v1484_v6, %v1162_v3 }
 0x1d5   : > { %v1579_v49 = vadd.f32 %v2990_v41, %v1490_v43 }
 0x1d6   : > { %v1578_v46 = vadd.f32 %v2990_v41, %v1485_v47  ;;  %v2313_v51 = vpop.f32.mrb[20].mxu0  ;;  %2385 = vmatprep.mubr.f32.mxu1 %v1608_v45 }
 0x1d7   : > { %v1500_v50 = vadd.f32 %v2313_v51, %v2245_v14  ;;  %v1494_v52 = vpop.f32.mrb[21].mxu0  ;;  %2386 = vmatmul.mubr.f32.gmra.mrb[32].mxu1 %v1609_v48  ;;  %v1611_v55 = vmax.f32 %v1579_v49, 0.0 }
 0x1d8   : > { %v1610_v53 = vmax.f32 %v1578_v46, 0.0  ;;  %v1495_v54 = vadd.f32 %v1494_v52, %v1172_v18 }
 0x1d9   : > { %v1581_v56 = vadd.f32 %v2990_v41, %v1500_v50 }
 0x1da   : > { %v1580_v59 = vadd.f32 %v2990_v41, %v1495_v54  ;;  %v2254_v60 = vpop.f32.mrb[10].mxu1  ;;  %v2316_v61 = vpop.f32.mrb[22].mxu0  ;;  %2388 = vmatprep.mubr.f32.mxu1 %v1610_v53 }
 0x1db   : > { %v1510_v62 = vadd.f32 %v2316_v61, %v2248_v28  ;;  %v1202_v63 = vpop.f32.mrb[11].mxu1  ;;  %v1504_v0 = vpop.f32.mrb[23].mxu0  ;;  %2389 = vmatmul.mubr.f32.gmra.mrb[34].mxu1 %v1611_v55  ;;  %v1613_v4 = vmax.f32 %v1581_v56, 0.0 }
 0x1dc   : > { %v1612_v2 = vmax.f32 %v1580_v59, 0.0  ;;  %v1505_v3 = vadd.f32 %v1504_v0, %v1182_v32 }
 0x1dd   : > { %v1583_v5 = vadd.f32 %v2990_v41, %v1510_v62 }
 0x1de   : > { %v1582_v7 = vadd.f32 %v2990_v41, %v1505_v3  ;;  %v2319_v8 = vpop.f32.mrb[24].mxu0  ;;  %2391 = vmatprep.mubr.f32.mxu1 %v1612_v2 }
 0x1df   : > { %v1520_v9 = vadd.f32 %v2319_v8, %v2251_v40  ;;  %v1514_v10 = vpop.f32.mrb[25].mxu0  ;;  %2392 = vmatmul.mubr.f32.gmra.mrb[36].mxu1 %v1613_v4  ;;  %v1615_v13 = vmax.f32 %v1583_v5, 0.0 }
 0x1e0   : > { %v1614_v11 = vmax.f32 %v1582_v7, 0.0  ;;  %v1515_v12 = vadd.f32 %v1514_v10, %v1192_v44  ;;  %v3033_v44 = vld [vmem:[%s3148_s8] ss:$0 sm:$0xff] }
 0x1e1   : > { %v1585_v14 = vadd.f32 %v2990_v41, %v1520_v9 }
 0x1e2   : > { %v1584_v15 = vadd.f32 %v2990_v41, %v1515_v12  ;;  %v2257_v16 = vpop.f32.mrb[12].mxu1  ;;  %v2322_v17 = vpop.f32.mrb[26].mxu0  ;;  %2394 = vmatprep.mubr.f32.mxu1 %v1614_v11 }
 0x1e3   : > { %v1530_v18 = vadd.f32 %v2322_v17, %v2254_v60  ;;  %v1212_v19 = vpop.f32.mrb[13].mxu1  ;;  %v1524_v20 = vpop.f32.mrb[27].mxu0  ;;  %2395 = vmatmul.mubr.f32.gmra.mrb[38].mxu1 %v1615_v13  ;;  %v1617_v23 = vmax.f32 %v1585_v14, 0.0 }
 0x1e4   : > { %v1616_v21 = vmax.f32 %v1584_v15, 0.0  ;;  %v1525_v22 = vadd.f32 %v1524_v20, %v1202_v63 }
 0x1e5   : > { %v1587_v24 = vadd.f32 %v2990_v41, %v1530_v18 }
 0x1e6   : > { %v1586_v25 = vadd.f32 %v2990_v41, %v1525_v22  ;;  %v2325_v26 = vpop.f32.mrb[28].mxu0  ;;  %2397 = vmatprep.mubr.f32.mxu1 %v1616_v21 }
 0x1e7   : > { %v1540_v27 = vadd.f32 %v2325_v26, %v2257_v16  ;;  %v1534_v28 = vpop.f32.mrb[29].mxu0  ;;  %2398 = vmatmul.mubr.f32.gmra.mrb[40].mxu1 %v1617_v23  ;;  %v1619_v31 = vmax.f32 %v1587_v24, 0.0 }
 0x1e8   : > { %v1618_v29 = vmax.f32 %v1586_v25, 0.0  ;;  %v1535_v30 = vadd.f32 %v1534_v28, %v1212_v19 }
 0x1e9   : > { %v1589_v32 = vadd.f32 %v2990_v41, %v1540_v27 }
 0x1ea   : > { %v1588_v33 = vadd.f32 %v2990_v41, %v1535_v30  ;;  %v2260_v35 = vpop.f32.mrb[14].mxu1  ;;  %v2328_v34 = vpop.f32.mrb[30].mxu0  ;;  %2400 = vmatprep.mubr.f32.mxu1 %v1618_v29 }
 0x1eb   : > { %v1550_v36 = vadd.f32 %v2328_v34, %v2260_v35  ;;  %v1222_v37 = vpop.f32.mrb[15].mxu1  ;;  %v1544_v38 = vpop.f32.mrb[31].mxu0  ;;  %2401 = vmatmul.mubr.f32.gmra.mrb[42].mxu1 %v1619_v31  ;;  %v1621_v39 = vmax.f32 %v1589_v32, 0.0 }
 0x1ec   : > { %v1620_v58 = vmax.f32 %v1588_v33, 0.0  ;;  %v1545_v57 = vadd.f32 %v1544_v38, %v1222_v37 }
 0x1ed   : > { %v1591_v1 = vadd.f32 %v2990_v41, %v1550_v36 }
 0x1ee   : > { %v1590_v40 = vadd.f32 %v2990_v41, %v1545_v57  ;;  %2403 = vmatprep.mubr.f32.mxu1 %v1620_v58 }
 0x1ef   : > { %2404 = vmatmul.mubr.f32.gmra.mrb[44].mxu1 %v1621_v39  ;;  %v1623_v43 = vmax.f32 %v1591_v1, 0.0 }
 0x1f0   : > { %v1622_v42 = vmax.f32 %v1590_v40, 0.0 }
 0x1f2   : > { %2406 = vmatprep.mubr.f32.mxu1 %v1622_v42 }
 0x1f3   : > { %2407 = vmatmul.mubr.f32.gmra.mrb[46].mxu1 %v1623_v43 }
 0x288   : > { %v2363_v41 = vpop.f32.mrb[16].mxu1 }
 0x289   : > { %v1719_v6 = vadd.f32 %v2363_v41, %v3033_v44  ;;  %v1713_v45 = vpop.f32.mrb[17].mxu1 }
 0x28a   : > { %v1714_v47 = vadd.f32 %v3033_v44, %v1713_v45 }
 0x28b   : > { %1874 = vst.msk [vmem:[%s3039_s11 + $0x8] sm:$0xff] %vm1872_vm2, %v1719_v6 }
 0x28c   : > { %1873 = vst.msk [vmem:[%s3039_s11] sm:$0xff] %vm1872_vm2, %v1714_v47  ;;  %v2366_v48 = vpop.f32.mrb[18].mxu1 }
 0x28d   : > { %v1729_v49 = vadd.f32 %v2366_v48, %v3033_v44  ;;  %v1723_v46 = vpop.f32.mrb[19].mxu1 }
 0x28e   : > { %v1724_v51 = vadd.f32 %v3033_v44, %v1723_v46 }
 0x28f   : > { %1876 = vst.msk [vmem:[%s3039_s11 + $0x18] sm:$0xff] %vm1872_vm2, %v1729_v49 }
 0x290   : > { %1875 = vst.msk [vmem:[%s3039_s11 + $0x10] sm:$0xff] %vm1872_vm2, %v1724_v51  ;;  %v2369_v50 = vpop.f32.mrb[20].mxu1 }
 0x291   : > { %v1739_v52 = vadd.f32 %v2369_v50, %v3033_v44  ;;  %v1733_v53 = vpop.f32.mrb[21].mxu1 }
 0x292   : > { %v1734_v54 = vadd.f32 %v3033_v44, %v1733_v53 }
 0x293   : > { %1878 = vst.msk [vmem:[%s3039_s11 + $0x28] sm:$0xff] %vm1872_vm2, %v1739_v52 }
 0x294   : > { %1877 = vst.msk [vmem:[%s3039_s11 + $0x20] sm:$0xff] %vm1872_vm2, %v1734_v54  ;;  %v2372_v55 = vpop.f32.mrb[22].mxu1 }
 0x295   : > { %v1749_v56 = vadd.f32 %v2372_v55, %v3033_v44  ;;  %v1743_v59 = vpop.f32.mrb[23].mxu1 }
 0x296   : > { %v1744_v60 = vadd.f32 %v3033_v44, %v1743_v59 }
 0x297   : > { %1880 = vst.msk [vmem:[%s3039_s11 + $0x38] sm:$0xff] %vm1872_vm2, %v1749_v56 }
 0x298   : > { %1879 = vst.msk [vmem:[%s3039_s11 + $0x30] sm:$0xff] %vm1872_vm2, %v1744_v60  ;;  %v2375_v61 = vpop.f32.mrb[24].mxu1 }
 0x299   : > { %v1759_v62 = vadd.f32 %v2375_v61, %v3033_v44  ;;  %v1753_v63 = vpop.f32.mrb[25].mxu1 }
 0x29a   : > { %v1754_v0 = vadd.f32 %v3033_v44, %v1753_v63 }
 0x29b   : > { %1882 = vst.msk [vmem:[%s3039_s11 + $0x48] sm:$0xff] %vm1872_vm2, %v1759_v62 }
 0x29c   : > { %1881 = vst.msk [vmem:[%s3039_s11 + $0x40] sm:$0xff] %vm1872_vm2, %v1754_v0  ;;  %v2378_v2 = vpop.f32.mrb[26].mxu1 }
 0x29d   : > { %v1769_v3 = vadd.f32 %v2378_v2, %v3033_v44  ;;  %v1763_v4 = vpop.f32.mrb[27].mxu1 }
 0x29e   : > { %v1764_v5 = vadd.f32 %v3033_v44, %v1763_v4 }
 0x29f   : > { %1884 = vst.msk [vmem:[%s3039_s11 + $0x58] sm:$0xff] %vm1872_vm2, %v1769_v3 }
 0x2a0   : > { %1883 = vst.msk [vmem:[%s3039_s11 + $0x50] sm:$0xff] %vm1872_vm2, %v1764_v5  ;;  %v2381_v7 = vpop.f32.mrb[28].mxu1 }
 0x2a1   : > { %v1779_v8 = vadd.f32 %v2381_v7, %v3033_v44  ;;  %v1773_v9 = vpop.f32.mrb[29].mxu1 }
 0x2a2   : > { %v1774_v10 = vadd.f32 %v3033_v44, %v1773_v9 }
 0x2a3   : > { %1886 = vst.msk [vmem:[%s3039_s11 + $0x68] sm:$0xff] %vm1872_vm2, %v1779_v8 }
 0x2a4   : > { %1885 = vst.msk [vmem:[%s3039_s11 + $0x60] sm:$0xff] %vm1872_vm2, %v1774_v10  ;;  %v2384_v11 = vpop.f32.mrb[30].mxu1 }
 0x2a5   : > { %v1789_v12 = vadd.f32 %v2384_v11, %v3033_v44  ;;  %v1783_v13 = vpop.f32.mrb[31].mxu1 }
 0x2a6   : > { %v1784_v14 = vadd.f32 %v3033_v44, %v1783_v13 }
 0x2a7   : > { %1888 = vst.msk [vmem:[%s3039_s11 + $0x78] sm:$0xff] %vm1872_vm2, %v1789_v12 }
 0x2a8   : > { %1887 = vst.msk [vmem:[%s3039_s11 + $0x70] sm:$0xff] %vm1872_vm2, %v1784_v14 }
 0x2aa   : > { %v2387_v15 = vpop.f32.mrb[32].mxu1 }
 0x2ab   : > { %v1799_v16 = vadd.f32 %v2387_v15, %v3033_v44  ;;  %v1793_v17 = vpop.f32.mrb[33].mxu1 }
 0x2ac   : > { %v1794_v18 = vadd.f32 %v3033_v44, %v1793_v17 }
 0x2ad   : > { %1890 = vst.msk [vmem:[%s3039_s11 + $0x88] sm:$0xff] %vm1872_vm2, %v1799_v16 }
 0x2ae   : > { %1889 = vst.msk [vmem:[%s3039_s11 + $0x80] sm:$0xff] %vm1872_vm2, %v1794_v18  ;;  %v2390_v19 = vpop.f32.mrb[34].mxu1 }
 0x2af   : > { %v1809_v20 = vadd.f32 %v2390_v19, %v3033_v44  ;;  %v1803_v21 = vpop.f32.mrb[35].mxu1 }
 0x2b0   : > { %v1804_v22 = vadd.f32 %v3033_v44, %v1803_v21 }
 0x2b1   : > { %1892 = vst.msk [vmem:[%s3039_s11 + $0x98] sm:$0xff] %vm1872_vm2, %v1809_v20 }
 0x2b2   : > { %1891 = vst.msk [vmem:[%s3039_s11 + $0x90] sm:$0xff] %vm1872_vm2, %v1804_v22  ;;  %v2393_v23 = vpop.f32.mrb[36].mxu1 }
 0x2b3   : > { %v1819_v24 = vadd.f32 %v2393_v23, %v3033_v44  ;;  %v1813_v25 = vpop.f32.mrb[37].mxu1 }
 0x2b4   : > { %v1814_v26 = vadd.f32 %v3033_v44, %v1813_v25 }
 0x2b5   : > { %1894 = vst.msk [vmem:[%s3039_s11 + $0xa8] sm:$0xff] %vm1872_vm2, %v1819_v24 }
 0x2b6   : > { %1893 = vst.msk [vmem:[%s3039_s11 + $0xa0] sm:$0xff] %vm1872_vm2, %v1814_v26  ;;  %v2396_v27 = vpop.f32.mrb[38].mxu1 }
 0x2b7   : > { %v1829_v28 = vadd.f32 %v2396_v27, %v3033_v44  ;;  %v1823_v29 = vpop.f32.mrb[39].mxu1 }
 0x2b8   : > { %v1824_v30 = vadd.f32 %v3033_v44, %v1823_v29 }
 0x2b9   : > { %1896 = vst.msk [vmem:[%s3039_s11 + $0xb8] sm:$0xff] %vm1872_vm2, %v1829_v28 }
 0x2ba   : > { %1895 = vst.msk [vmem:[%s3039_s11 + $0xb0] sm:$0xff] %vm1872_vm2, %v1824_v30  ;;  %v2399_v31 = vpop.f32.mrb[40].mxu1 }
 0x2bb   : > { %v1839_v32 = vadd.f32 %v2399_v31, %v3033_v44  ;;  %v1833_v33 = vpop.f32.mrb[41].mxu1 }
 0x2bc   : > { %v1834_v35 = vadd.f32 %v3033_v44, %v1833_v33 }
 0x2bd   : > { %1898 = vst.msk [vmem:[%s3039_s11 + $0xc8] sm:$0xff] %vm1872_vm2, %v1839_v32 }
 0x2be   : > { %1897 = vst.msk [vmem:[%s3039_s11 + $0xc0] sm:$0xff] %vm1872_vm2, %v1834_v35  ;;  %v2402_v34 = vpop.f32.mrb[42].mxu1 }
 0x2bf   : > { %v1849_v36 = vadd.f32 %v2402_v34, %v3033_v44  ;;  %v1843_v37 = vpop.f32.mrb[43].mxu1 }
 0x2c0   : > { %v1844_v38 = vadd.f32 %v3033_v44, %v1843_v37 }
 0x2c1   : > { %1900 = vst.msk [vmem:[%s3039_s11 + $0xd8] sm:$0xff] %vm1872_vm2, %v1849_v36 }
 0x2c2   : > { %1899 = vst.msk [vmem:[%s3039_s11 + $0xd0] sm:$0xff] %vm1872_vm2, %v1844_v38  ;;  %v2405_v58 = vpop.f32.mrb[44].mxu1 }
 0x2c3   : > { %v1859_v57 = vadd.f32 %v2405_v58, %v3033_v44  ;;  %v1853_v39 = vpop.f32.mrb[45].mxu1 }
 0x2c4   : > { %v1854_v1 = vadd.f32 %v3033_v44, %v1853_v39 }
 0x2c5   : > { %1902 = vst.msk [vmem:[%s3039_s11 + $0xe8] sm:$0xff] %vm1872_vm2, %v1859_v57 }
 0x2c6   : > { %1901 = vst.msk [vmem:[%s3039_s11 + $0xe0] sm:$0xff] %vm1872_vm2, %v1854_v1  ;;  %v2408_v40 = vpop.f32.mrb[46].mxu1 }
 0x2c7   : > { %v1869_v42 = vadd.f32 %v2408_v40, %v3033_v44  ;;  %v1863_v43 = vpop.f32.mrb[47].mxu1 }
 0x2c8   : > { %v1864_v41 = vadd.f32 %v3033_v44, %v1863_v43 }
 0x2c9   : > { %1904 = vst.msk [vmem:[%s3039_s11 + $0xf8] sm:$0xff] %vm1872_vm2, %v1869_v42 }
 0x2ca   : > { %1903 = vst.msk [vmem:[%s3039_s11 + $0xf0] sm:$0xff] %vm1872_vm2, %v1864_v41 }
 0x2cb PF: > { %s19_s30 = sadd.s32 1, %s2550_s30  }
 0x2cc   : > { %p16_p4 = scmp.ge.s32.totalorder %s19_s30, 4  }
 0x2ce   :  { %18 = sbr.rel (!%p16_p4) target bundleno = 1 (0x1), region = 89 }

</bundles_post_ra>
